<compile_context>
chip_gen: v7x
topology: tpu7x:2x2x1
jax: 0.10.0
libtpu: 0.0.40
codegen_flags: <defaults>
</compile_context>

<pallas_src>
import jax
import jax.numpy as jnp
from jax.experimental import pallas as pl
from jax.experimental.pallas import tpu as pltpu


def fused_deconv_kernel(x_ref, *refs):
    """Fused 5-layer ConvTranspose2d(2x2, stride 2) + ReLU decoder.

    x_ref : (1, P0, C0)          pixel-major input for one batch element
    refs  : w1, b1, ..., w5, b5, o_ref
            w_i : (4, Cin_i, Cout_i)  per-tap weights, tap index = kh*2 + kw
            b_i : (1, Cout_i)
            o   : (1, P0*4**5, C5)    pixel-major output, row = tap-blocked
    """
    *wb, o_ref = refs
    n_layers = len(wb) // 2

    p = x_ref.shape[1]
    x = x_ref[0]                                    # (P0, C0), f32

    for i in range(n_layers):
        w_ref, b_ref = wb[2 * i], wb[2 * i + 1]
        cout = w_ref.shape[2]
        bias = b_ref[...]                           # (1, Cout)
        taps = []
        for t in range(4):                          # the 4 (kh, kw) taps
            y = jnp.dot(x, w_ref[t],                # (P, Cin) @ (Cin, Cout)
                        preferred_element_type=jnp.float32)
            taps.append(jnp.maximum(y + bias, 0.0))  # bias + ReLU in f32 (VPU)
        # Append taps as row blocks: new row index = t * p + old_row.
        # Activations stay VMEM/vreg-resident; nothing goes back to HBM.
        x = jnp.stack(taps, axis=0).reshape(4 * p, cout)
        p *= 4

    o_ref[0] = x.astype(o_ref.dtype)


def conv_decoder(x_nchw, params):
    """Forward pass matching ConvDecoder.forward.  Input/output are NCHW."""
    N, c_in, H, W = x_nchw.shape
    n_layers = len(params)

    # NCHW -> pixel-major (N, H*W, Cin).  Pure layout plumbing.
    x3 = jnp.transpose(x_nchw, (0, 2, 3, 1)).reshape(N, H * W, c_in)

    kernel_args = [x3]
    in_specs = [pl.BlockSpec((1, H * W, c_in), lambda n: (n, 0, 0))]
    for w, b in params:
        ci, co = w.shape[0], w.shape[1]
        # (Cin, Cout, 2, 2) -> (4, Cin, Cout), tap index = kh*2 + kw.
        w4 = jnp.transpose(w, (2, 3, 0, 1)).reshape(4, ci, co)
        b2 = b.reshape(1, co)
        kernel_args += [w4, b2]
        in_specs += [
            pl.BlockSpec(w4.shape, lambda n: (0, 0, 0)),  # VMEM-resident
            pl.BlockSpec(b2.shape, lambda n: (0, 0)),
        ]

    c_last = params[-1][0].shape[1]
    p_out = H * W * 4 ** n_layers
    out_shape = jax.ShapeDtypeStruct((N, p_out, c_last), jnp.float32)

    flat = pl.pallas_call(
        fused_deconv_kernel,
        out_shape=out_shape,
        grid=(N,),
        in_specs=in_specs,
        out_specs=pl.BlockSpec((1, p_out, c_last), lambda n: (n, 0, 0)),
        compiler_params=pltpu.CompilerParams(
            dimension_semantics=("parallel",)),   # v7x: one batch per TC
    )(*kernel_args)

    # Undo the deferred 2x2 scatters (pure permutation on a tiny output).
    # Within a batch element: row = T * (H*W) + (h*W + w) with
    # T = t5*256 + t4*64 + t3*16 + t2*4 + t1 and t_i = kh_i*2 + kw_i.
    # Peel one tap per step so rank never exceeds 7.
    a = flat.reshape(N, 4 ** n_layers, H, W, c_last)
    for _ in range(n_layers):
        n_, r, hc, wc, c = a.shape
        a = a.reshape(n_, r // 4, 2, 2, hc, wc, c)   # minor factor = (kh_i, kw_i)
        a = a.transpose(0, 1, 4, 2, 5, 3, 6)          # (n, r', hc, kh, wc, kw, c)
        a = a.reshape(n_, r // 4, hc * 2, wc * 2, c)
    a = a.reshape(N, H * 2 ** n_layers, W * 2 ** n_layers, c_last)
    return jnp.transpose(a, (0, 3, 1, 2))             # NHWC -> NCHW


def init_params(key):
    """Deterministic PyTorch-like init for the five ConvTranspose2d layers."""
    channels = [256, 128, 64, 32, 16, 3]
    params = []
    for i in range(5):
        key, kw, kb = jax.random.split(key, 3)
        cin, cout = channels[i], channels[i + 1]
        bound = 1.0 / ((cout * 2 * 2) ** 0.5)
        w = jax.random.uniform(kw, (cin, cout, 2, 2), jnp.float32,
                               minval=-bound, maxval=bound)
        b = jax.random.uniform(kb, (cout,), jnp.float32,
                               minval=-bound, maxval=bound)
        params.append((w, b))
    return params


def ref_decoder(x_nchw, params):
    """Pure-JAX reference (nn.ConvTranspose2d(2,2,stride=2) + ReLU chain)."""
    x = jnp.transpose(x_nchw, (0, 2, 3, 1))            # NHWC
    for w, b in params:
        n, h, wd, _ = x.shape
        co = w.shape[1]
        y = jnp.einsum('nhwi,iokl->nhkwlo', x, w,
                       precision=jax.lax.Precision.HIGHEST)
        y = y.reshape(n, 2 * h, 2 * wd, co) + b
        x = jnp.maximum(y, 0.0)
    return jnp.transpose(x, (0, 3, 1, 2))


if __name__ == "__main__":
    key = jax.random.PRNGKey(0)
    k_x, k_p = jax.random.split(key)

    # Decoder input consistent with the module: NCHW, 256 channels, 1x1 spatial
    # (1 -> 2 -> 4 -> 8 -> 16 -> 32 after the five stride-2 deconvs).
    x = jax.random.normal(k_x, (2, 256, 1, 1), dtype=jnp.float32)
    params = init_params(k_p)

    out = conv_decoder(x, params)
    out = jax.block_until_ready(out)

    assert out.shape == (2, 3, 32, 32), out.shape
    assert bool(jnp.all(out >= 0.0))                   # final ReLU => non-negative

    ref = ref_decoder(x, params)
    assert bool(jnp.allclose(out, ref, atol=5e-2, rtol=5e-2)), \
        float(jnp.max(jnp.abs(out - ref)))
    print("KERNEL_OK")
</pallas_src>

<mosaic_0001>
module attributes {stable_mosaic.version = 11 : i64} {
  func.func @fused_deconv_kernel(%arg0: i32, %arg1: memref<1x1x256xf32, #tpu.memory_space<vmem>>, %arg2: memref<4x256x128xf32, #tpu.memory_space<vmem>>, %arg3: memref<1x128xf32, #tpu.memory_space<vmem>>, %arg4: memref<4x128x64xf32, #tpu.memory_space<vmem>>, %arg5: memref<1x64xf32, #tpu.memory_space<vmem>>, %arg6: memref<4x64x32xf32, #tpu.memory_space<vmem>>, %arg7: memref<1x32xf32, #tpu.memory_space<vmem>>, %arg8: memref<4x32x16xf32, #tpu.memory_space<vmem>>, %arg9: memref<1x16xf32, #tpu.memory_space<vmem>>, %arg10: memref<4x16x3xf32, #tpu.memory_space<vmem>>, %arg11: memref<1x3xf32, #tpu.memory_space<vmem>>, %arg12: memref<1x1024x3xf32, #tpu.memory_space<vmem>>) attributes {dimension_semantics = [#tpu.dimension_semantics<parallel>], iteration_bounds = array<i64: 2>, scalar_prefetch = 0 : i64, scratch_operands = 0 : i64, tpu.core_type = #tpu.core_type<tc>, window_params = [{transform_indices = @transform_0, window_bounds = array<i64: 1, 1, 256>}, {pipeline_mode = #tpu.pipeline_mode<synchronous>, transform_indices = @transform_1, window_bounds = array<i64: 4, 256, 128>}, {pipeline_mode = #tpu.pipeline_mode<synchronous>, transform_indices = @transform_2, window_bounds = array<i64: 1, 128>}, {pipeline_mode = #tpu.pipeline_mode<synchronous>, transform_indices = @transform_3, window_bounds = array<i64: 4, 128, 64>}, {pipeline_mode = #tpu.pipeline_mode<synchronous>, transform_indices = @transform_4, window_bounds = array<i64: 1, 64>}, {pipeline_mode = #tpu.pipeline_mode<synchronous>, transform_indices = @transform_5, window_bounds = array<i64: 4, 64, 32>}, {pipeline_mode = #tpu.pipeline_mode<synchronous>, transform_indices = @transform_6, window_bounds = array<i64: 1, 32>}, {pipeline_mode = #tpu.pipeline_mode<synchronous>, transform_indices = @transform_7, window_bounds = array<i64: 4, 32, 16>}, {pipeline_mode = #tpu.pipeline_mode<synchronous>, transform_indices = @transform_8, window_bounds = array<i64: 1, 16>}, {pipeline_mode = #tpu.pipeline_mode<synchronous>, transform_indices = @transform_9, window_bounds = array<i64: 4, 16, 3>}, {pipeline_mode = #tpu.pipeline_mode<synchronous>, transform_indices = @transform_10, window_bounds = array<i64: 1, 3>}, {transform_indices = @transform_11, window_bounds = array<i64: 1, 1024, 3>}]} {
    %c0 = arith.constant 0 : index
    %c0_0 = arith.constant 0 : index
    %c0_1 = arith.constant 0 : index
    %0 = vector.load %arg1[%c0, %c0_0, %c0_1] : memref<1x1x256xf32, #tpu.memory_space<vmem>>, vector<1x1x256xf32>
    %1 = vector.shape_cast %0 : vector<1x1x256xf32> to vector<1x256xf32>
    %c0_2 = arith.constant 0 : index
    %c0_3 = arith.constant 0 : index
    %2 = vector.load %arg3[%c0_2, %c0_3] : memref<1x128xf32, #tpu.memory_space<vmem>>, vector<1x128xf32>
    %c0_4 = arith.constant 0 : index
    %c0_5 = arith.constant 0 : index
    %c0_6 = arith.constant 0 : index
    %3 = vector.load %arg2[%c0_4, %c0_5, %c0_6] : memref<4x256x128xf32, #tpu.memory_space<vmem>>, vector<1x256x128xf32>
    %4 = vector.shape_cast %3 : vector<1x256x128xf32> to vector<256x128xf32>
    %cst = arith.constant dense<0.000000e+00> : vector<1x128xf32>
    %5 = tpu.matmul %1, %4, %cst {dimension_numbers = #tpu.dot_dimension_numbers<[1], [0], [0], [1], [0, 0, 1, 1], [], []>} : vector<1x256xf32>, vector<256x128xf32>, vector<1x128xf32> -> vector<1x128xf32>
    %6 = arith.addf %5, %2 : vector<1x128xf32>
    %cst_7 = arith.constant 0.000000e+00 : f32
    %7 = vector.broadcast %cst_7 : f32 to vector<1x128xf32>
    %8 = arith.maximumf %6, %7 : vector<1x128xf32>
    %c1 = arith.constant 1 : index
    %c0_8 = arith.constant 0 : index
    %c0_9 = arith.constant 0 : index
    %9 = vector.load %arg2[%c1, %c0_8, %c0_9] : memref<4x256x128xf32, #tpu.memory_space<vmem>>, vector<1x256x128xf32>
    %10 = vector.shape_cast %9 : vector<1x256x128xf32> to vector<256x128xf32>
    %cst_10 = arith.constant dense<0.000000e+00> : vector<1x128xf32>
    %11 = tpu.matmul %1, %10, %cst_10 {dimension_numbers = #tpu.dot_dimension_numbers<[1], [0], [0], [1], [0, 0, 1, 1], [], []>} : vector<1x256xf32>, vector<256x128xf32>, vector<1x128xf32> -> vector<1x128xf32>
    %12 = arith.addf %11, %2 : vector<1x128xf32>
    %cst_11 = arith.constant 0.000000e+00 : f32
    %13 = vector.broadcast %cst_11 : f32 to vector<1x128xf32>
    %14 = arith.maximumf %12, %13 : vector<1x128xf32>
    %c2 = arith.constant 2 : index
    %c0_12 = arith.constant 0 : index
    %c0_13 = arith.constant 0 : index
    %15 = vector.load %arg2[%c2, %c0_12, %c0_13] : memref<4x256x128xf32, #tpu.memory_space<vmem>>, vector<1x256x128xf32>
    %16 = vector.shape_cast %15 : vector<1x256x128xf32> to vector<256x128xf32>
    %cst_14 = arith.constant dense<0.000000e+00> : vector<1x128xf32>
    %17 = tpu.matmul %1, %16, %cst_14 {dimension_numbers = #tpu.dot_dimension_numbers<[1], [0], [0], [1], [0, 0, 1, 1], [], []>} : vector<1x256xf32>, vector<256x128xf32>, vector<1x128xf32> -> vector<1x128xf32>
    %18 = arith.addf %17, %2 : vector<1x128xf32>
    %cst_15 = arith.constant 0.000000e+00 : f32
    %19 = vector.broadcast %cst_15 : f32 to vector<1x128xf32>
    %20 = arith.maximumf %18, %19 : vector<1x128xf32>
    %c3 = arith.constant 3 : index
    %c0_16 = arith.constant 0 : index
    %c0_17 = arith.constant 0 : index
    %21 = vector.load %arg2[%c3, %c0_16, %c0_17] : memref<4x256x128xf32, #tpu.memory_space<vmem>>, vector<1x256x128xf32>
    %22 = vector.shape_cast %21 : vector<1x256x128xf32> to vector<256x128xf32>
    %cst_18 = arith.constant dense<0.000000e+00> : vector<1x128xf32>
    %23 = tpu.matmul %1, %22, %cst_18 {dimension_numbers = #tpu.dot_dimension_numbers<[1], [0], [0], [1], [0, 0, 1, 1], [], []>} : vector<1x256xf32>, vector<256x128xf32>, vector<1x128xf32> -> vector<1x128xf32>
    %24 = arith.addf %23, %2 : vector<1x128xf32>
    %cst_19 = arith.constant 0.000000e+00 : f32
    %25 = vector.broadcast %cst_19 : f32 to vector<1x128xf32>
    %26 = arith.maximumf %24, %25 : vector<1x128xf32>
    %27 = vector.shape_cast %8 : vector<1x128xf32> to vector<1x1x128xf32>
    %28 = vector.shape_cast %14 : vector<1x128xf32> to vector<1x1x128xf32>
    %29 = vector.shape_cast %20 : vector<1x128xf32> to vector<1x1x128xf32>
    %30 = vector.shape_cast %26 : vector<1x128xf32> to vector<1x1x128xf32>
    %31 = tpu.concatenate %27, %28, %29, %30 in 0 : vector<1x1x128xf32>, vector<1x1x128xf32>, vector<1x1x128xf32>, vector<1x1x128xf32> -> vector<4x1x128xf32>
    %32 = vector.shape_cast %31 : vector<4x1x128xf32> to vector<4x128xf32>
    %c0_20 = arith.constant 0 : index
    %c0_21 = arith.constant 0 : index
    %33 = vector.load %arg5[%c0_20, %c0_21] : memref<1x64xf32, #tpu.memory_space<vmem>>, vector<1x64xf32>
    %c0_22 = arith.constant 0 : index
    %c0_23 = arith.constant 0 : index
    %c0_24 = arith.constant 0 : index
    %34 = vector.load %arg4[%c0_22, %c0_23, %c0_24] : memref<4x128x64xf32, #tpu.memory_space<vmem>>, vector<1x128x64xf32>
    %35 = vector.shape_cast %34 : vector<1x128x64xf32> to vector<128x64xf32>
    %cst_25 = arith.constant dense<0.000000e+00> : vector<4x64xf32>
    %36 = tpu.matmul %32, %35, %cst_25 {dimension_numbers = #tpu.dot_dimension_numbers<[1], [0], [0], [1], [0, 0, 1, 1], [], []>} : vector<4x128xf32>, vector<128x64xf32>, vector<4x64xf32> -> vector<4x64xf32>
    %37 = vector.broadcast %33 : vector<1x64xf32> to vector<4x64xf32>
    %38 = arith.addf %36, %37 : vector<4x64xf32>
    %cst_26 = arith.constant 0.000000e+00 : f32
    %39 = vector.broadcast %cst_26 : f32 to vector<4x64xf32>
    %40 = arith.maximumf %38, %39 : vector<4x64xf32>
    %c1_27 = arith.constant 1 : index
    %c0_28 = arith.constant 0 : index
    %c0_29 = arith.constant 0 : index
    %41 = vector.load %arg4[%c1_27, %c0_28, %c0_29] : memref<4x128x64xf32, #tpu.memory_space<vmem>>, vector<1x128x64xf32>
    %42 = vector.shape_cast %41 : vector<1x128x64xf32> to vector<128x64xf32>
    %cst_30 = arith.constant dense<0.000000e+00> : vector<4x64xf32>
    %43 = tpu.matmul %32, %42, %cst_30 {dimension_numbers = #tpu.dot_dimension_numbers<[1], [0], [0], [1], [0, 0, 1, 1], [], []>} : vector<4x128xf32>, vector<128x64xf32>, vector<4x64xf32> -> vector<4x64xf32>
    %44 = vector.broadcast %33 : vector<1x64xf32> to vector<4x64xf32>
    %45 = arith.addf %43, %44 : vector<4x64xf32>
    %cst_31 = arith.constant 0.000000e+00 : f32
    %46 = vector.broadcast %cst_31 : f32 to vector<4x64xf32>
    %47 = arith.maximumf %45, %46 : vector<4x64xf32>
    %c2_32 = arith.constant 2 : index
    %c0_33 = arith.constant 0 : index
    %c0_34 = arith.constant 0 : index
    %48 = vector.load %arg4[%c2_32, %c0_33, %c0_34] : memref<4x128x64xf32, #tpu.memory_space<vmem>>, vector<1x128x64xf32>
    %49 = vector.shape_cast %48 : vector<1x128x64xf32> to vector<128x64xf32>
    %cst_35 = arith.constant dense<0.000000e+00> : vector<4x64xf32>
    %50 = tpu.matmul %32, %49, %cst_35 {dimension_numbers = #tpu.dot_dimension_numbers<[1], [0], [0], [1], [0, 0, 1, 1], [], []>} : vector<4x128xf32>, vector<128x64xf32>, vector<4x64xf32> -> vector<4x64xf32>
    %51 = vector.broadcast %33 : vector<1x64xf32> to vector<4x64xf32>
    %52 = arith.addf %50, %51 : vector<4x64xf32>
    %cst_36 = arith.constant 0.000000e+00 : f32
    %53 = vector.broadcast %cst_36 : f32 to vector<4x64xf32>
    %54 = arith.maximumf %52, %53 : vector<4x64xf32>
    %c3_37 = arith.constant 3 : index
    %c0_38 = arith.constant 0 : index
    %c0_39 = arith.constant 0 : index
    %55 = vector.load %arg4[%c3_37, %c0_38, %c0_39] : memref<4x128x64xf32, #tpu.memory_space<vmem>>, vector<1x128x64xf32>
    %56 = vector.shape_cast %55 : vector<1x128x64xf32> to vector<128x64xf32>
    %cst_40 = arith.constant dense<0.000000e+00> : vector<4x64xf32>
    %57 = tpu.matmul %32, %56, %cst_40 {dimension_numbers = #tpu.dot_dimension_numbers<[1], [0], [0], [1], [0, 0, 1, 1], [], []>} : vector<4x128xf32>, vector<128x64xf32>, vector<4x64xf32> -> vector<4x64xf32>
    %58 = vector.broadcast %33 : vector<1x64xf32> to vector<4x64xf32>
    %59 = arith.addf %57, %58 : vector<4x64xf32>
    %cst_41 = arith.constant 0.000000e+00 : f32
    %60 = vector.broadcast %cst_41 : f32 to vector<4x64xf32>
    %61 = arith.maximumf %59, %60 : vector<4x64xf32>
    %62 = vector.shape_cast %40 : vector<4x64xf32> to vector<1x4x64xf32>
    %63 = vector.shape_cast %47 : vector<4x64xf32> to vector<1x4x64xf32>
    %64 = vector.shape_cast %54 : vector<4x64xf32> to vector<1x4x64xf32>
    %65 = vector.shape_cast %61 : vector<4x64xf32> to vector<1x4x64xf32>
    %66 = tpu.concatenate %62, %63, %64, %65 in 0 : vector<1x4x64xf32>, vector<1x4x64xf32>, vector<1x4x64xf32>, vector<1x4x64xf32> -> vector<4x4x64xf32>
    %67 = vector.shape_cast %66 : vector<4x4x64xf32> to vector<16x64xf32>
    %c0_42 = arith.constant 0 : index
    %c0_43 = arith.constant 0 : index
    %68 = vector.load %arg7[%c0_42, %c0_43] : memref<1x32xf32, #tpu.memory_space<vmem>>, vector<1x32xf32>
    %c0_44 = arith.constant 0 : index
    %c0_45 = arith.constant 0 : index
    %c0_46 = arith.constant 0 : index
    %69 = vector.load %arg6[%c0_44, %c0_45, %c0_46] : memref<4x64x32xf32, #tpu.memory_space<vmem>>, vector<1x64x32xf32>
    %70 = vector.shape_cast %69 : vector<1x64x32xf32> to vector<64x32xf32>
    %cst_47 = arith.constant dense<0.000000e+00> : vector<16x32xf32>
    %71 = tpu.matmul %67, %70, %cst_47 {dimension_numbers = #tpu.dot_dimension_numbers<[1], [0], [0], [1], [0, 0, 1, 1], [], []>} : vector<16x64xf32>, vector<64x32xf32>, vector<16x32xf32> -> vector<16x32xf32>
    %72 = vector.broadcast %68 : vector<1x32xf32> to vector<16x32xf32>
    %73 = arith.addf %71, %72 : vector<16x32xf32>
    %cst_48 = arith.constant 0.000000e+00 : f32
    %74 = vector.broadcast %cst_48 : f32 to vector<16x32xf32>
    %75 = arith.maximumf %73, %74 : vector<16x32xf32>
    %c1_49 = arith.constant 1 : index
    %c0_50 = arith.constant 0 : index
    %c0_51 = arith.constant 0 : index
    %76 = vector.load %arg6[%c1_49, %c0_50, %c0_51] : memref<4x64x32xf32, #tpu.memory_space<vmem>>, vector<1x64x32xf32>
    %77 = vector.shape_cast %76 : vector<1x64x32xf32> to vector<64x32xf32>
    %cst_52 = arith.constant dense<0.000000e+00> : vector<16x32xf32>
    %78 = tpu.matmul %67, %77, %cst_52 {dimension_numbers = #tpu.dot_dimension_numbers<[1], [0], [0], [1], [0, 0, 1, 1], [], []>} : vector<16x64xf32>, vector<64x32xf32>, vector<16x32xf32> -> vector<16x32xf32>
    %79 = vector.broadcast %68 : vector<1x32xf32> to vector<16x32xf32>
    %80 = arith.addf %78, %79 : vector<16x32xf32>
    %cst_53 = arith.constant 0.000000e+00 : f32
    %81 = vector.broadcast %cst_53 : f32 to vector<16x32xf32>
    %82 = arith.maximumf %80, %81 : vector<16x32xf32>
    %c2_54 = arith.constant 2 : index
    %c0_55 = arith.constant 0 : index
    %c0_56 = arith.constant 0 : index
    %83 = vector.load %arg6[%c2_54, %c0_55, %c0_56] : memref<4x64x32xf32, #tpu.memory_space<vmem>>, vector<1x64x32xf32>
    %84 = vector.shape_cast %83 : vector<1x64x32xf32> to vector<64x32xf32>
    %cst_57 = arith.constant dense<0.000000e+00> : vector<16x32xf32>
    %85 = tpu.matmul %67, %84, %cst_57 {dimension_numbers = #tpu.dot_dimension_numbers<[1], [0], [0], [1], [0, 0, 1, 1], [], []>} : vector<16x64xf32>, vector<64x32xf32>, vector<16x32xf32> -> vector<16x32xf32>
    %86 = vector.broadcast %68 : vector<1x32xf32> to vector<16x32xf32>
    %87 = arith.addf %85, %86 : vector<16x32xf32>
    %cst_58 = arith.constant 0.000000e+00 : f32
    %88 = vector.broadcast %cst_58 : f32 to vector<16x32xf32>
    %89 = arith.maximumf %87, %88 : vector<16x32xf32>
    %c3_59 = arith.constant 3 : index
    %c0_60 = arith.constant 0 : index
    %c0_61 = arith.constant 0 : index
    %90 = vector.load %arg6[%c3_59, %c0_60, %c0_61] : memref<4x64x32xf32, #tpu.memory_space<vmem>>, vector<1x64x32xf32>
    %91 = vector.shape_cast %90 : vector<1x64x32xf32> to vector<64x32xf32>
    %cst_62 = arith.constant dense<0.000000e+00> : vector<16x32xf32>
    %92 = tpu.matmul %67, %91, %cst_62 {dimension_numbers = #tpu.dot_dimension_numbers<[1], [0], [0], [1], [0, 0, 1, 1], [], []>} : vector<16x64xf32>, vector<64x32xf32>, vector<16x32xf32> -> vector<16x32xf32>
    %93 = vector.broadcast %68 : vector<1x32xf32> to vector<16x32xf32>
    %94 = arith.addf %92, %93 : vector<16x32xf32>
    %cst_63 = arith.constant 0.000000e+00 : f32
    %95 = vector.broadcast %cst_63 : f32 to vector<16x32xf32>
    %96 = arith.maximumf %94, %95 : vector<16x32xf32>
    %97 = vector.shape_cast %75 : vector<16x32xf32> to vector<1x16x32xf32>
    %98 = vector.shape_cast %82 : vector<16x32xf32> to vector<1x16x32xf32>
    %99 = vector.shape_cast %89 : vector<16x32xf32> to vector<1x16x32xf32>
    %100 = vector.shape_cast %96 : vector<16x32xf32> to vector<1x16x32xf32>
    %101 = tpu.concatenate %97, %98, %99, %100 in 0 : vector<1x16x32xf32>, vector<1x16x32xf32>, vector<1x16x32xf32>, vector<1x16x32xf32> -> vector<4x16x32xf32>
    %102 = vector.shape_cast %101 : vector<4x16x32xf32> to vector<64x32xf32>
    %c0_64 = arith.constant 0 : index
    %c0_65 = arith.constant 0 : index
    %103 = vector.load %arg9[%c0_64, %c0_65] : memref<1x16xf32, #tpu.memory_space<vmem>>, vector<1x16xf32>
    %c0_66 = arith.constant 0 : index
    %c0_67 = arith.constant 0 : index
    %c0_68 = arith.constant 0 : index
    %104 = vector.load %arg8[%c0_66, %c0_67, %c0_68] : memref<4x32x16xf32, #tpu.memory_space<vmem>>, vector<1x32x16xf32>
    %105 = vector.shape_cast %104 : vector<1x32x16xf32> to vector<32x16xf32>
    %cst_69 = arith.constant dense<0.000000e+00> : vector<64x16xf32>
    %106 = tpu.matmul %102, %105, %cst_69 {dimension_numbers = #tpu.dot_dimension_numbers<[1], [0], [0], [1], [0, 0, 1, 1], [], []>} : vector<64x32xf32>, vector<32x16xf32>, vector<64x16xf32> -> vector<64x16xf32>
    %107 = vector.broadcast %103 : vector<1x16xf32> to vector<64x16xf32>
    %108 = arith.addf %106, %107 : vector<64x16xf32>
    %cst_70 = arith.constant 0.000000e+00 : f32
    %109 = vector.broadcast %cst_70 : f32 to vector<64x16xf32>
    %110 = arith.maximumf %108, %109 : vector<64x16xf32>
    %c1_71 = arith.constant 1 : index
    %c0_72 = arith.constant 0 : index
    %c0_73 = arith.constant 0 : index
    %111 = vector.load %arg8[%c1_71, %c0_72, %c0_73] : memref<4x32x16xf32, #tpu.memory_space<vmem>>, vector<1x32x16xf32>
    %112 = vector.shape_cast %111 : vector<1x32x16xf32> to vector<32x16xf32>
    %cst_74 = arith.constant dense<0.000000e+00> : vector<64x16xf32>
    %113 = tpu.matmul %102, %112, %cst_74 {dimension_numbers = #tpu.dot_dimension_numbers<[1], [0], [0], [1], [0, 0, 1, 1], [], []>} : vector<64x32xf32>, vector<32x16xf32>, vector<64x16xf32> -> vector<64x16xf32>
    %114 = vector.broadcast %103 : vector<1x16xf32> to vector<64x16xf32>
    %115 = arith.addf %113, %114 : vector<64x16xf32>
    %cst_75 = arith.constant 0.000000e+00 : f32
    %116 = vector.broadcast %cst_75 : f32 to vector<64x16xf32>
    %117 = arith.maximumf %115, %116 : vector<64x16xf32>
    %c2_76 = arith.constant 2 : index
    %c0_77 = arith.constant 0 : index
    %c0_78 = arith.constant 0 : index
    %118 = vector.load %arg8[%c2_76, %c0_77, %c0_78] : memref<4x32x16xf32, #tpu.memory_space<vmem>>, vector<1x32x16xf32>
    %119 = vector.shape_cast %118 : vector<1x32x16xf32> to vector<32x16xf32>
    %cst_79 = arith.constant dense<0.000000e+00> : vector<64x16xf32>
    %120 = tpu.matmul %102, %119, %cst_79 {dimension_numbers = #tpu.dot_dimension_numbers<[1], [0], [0], [1], [0, 0, 1, 1], [], []>} : vector<64x32xf32>, vector<32x16xf32>, vector<64x16xf32> -> vector<64x16xf32>
    %121 = vector.broadcast %103 : vector<1x16xf32> to vector<64x16xf32>
    %122 = arith.addf %120, %121 : vector<64x16xf32>
    %cst_80 = arith.constant 0.000000e+00 : f32
    %123 = vector.broadcast %cst_80 : f32 to vector<64x16xf32>
    %124 = arith.maximumf %122, %123 : vector<64x16xf32>
    %c3_81 = arith.constant 3 : index
    %c0_82 = arith.constant 0 : index
    %c0_83 = arith.constant 0 : index
    %125 = vector.load %arg8[%c3_81, %c0_82, %c0_83] : memref<4x32x16xf32, #tpu.memory_space<vmem>>, vector<1x32x16xf32>
    %126 = vector.shape_cast %125 : vector<1x32x16xf32> to vector<32x16xf32>
    %cst_84 = arith.constant dense<0.000000e+00> : vector<64x16xf32>
    %127 = tpu.matmul %102, %126, %cst_84 {dimension_numbers = #tpu.dot_dimension_numbers<[1], [0], [0], [1], [0, 0, 1, 1], [], []>} : vector<64x32xf32>, vector<32x16xf32>, vector<64x16xf32> -> vector<64x16xf32>
    %128 = vector.broadcast %103 : vector<1x16xf32> to vector<64x16xf32>
    %129 = arith.addf %127, %128 : vector<64x16xf32>
    %cst_85 = arith.constant 0.000000e+00 : f32
    %130 = vector.broadcast %cst_85 : f32 to vector<64x16xf32>
    %131 = arith.maximumf %129, %130 : vector<64x16xf32>
    %132 = vector.shape_cast %110 : vector<64x16xf32> to vector<1x64x16xf32>
    %133 = vector.shape_cast %117 : vector<64x16xf32> to vector<1x64x16xf32>
    %134 = vector.shape_cast %124 : vector<64x16xf32> to vector<1x64x16xf32>
    %135 = vector.shape_cast %131 : vector<64x16xf32> to vector<1x64x16xf32>
    %136 = tpu.concatenate %132, %133, %134, %135 in 0 : vector<1x64x16xf32>, vector<1x64x16xf32>, vector<1x64x16xf32>, vector<1x64x16xf32> -> vector<4x64x16xf32>
    %137 = vector.shape_cast %136 : vector<4x64x16xf32> to vector<256x16xf32>
    %c0_86 = arith.constant 0 : index
    %c0_87 = arith.constant 0 : index
    %138 = vector.load %arg11[%c0_86, %c0_87] : memref<1x3xf32, #tpu.memory_space<vmem>>, vector<1x3xf32>
    %c0_88 = arith.constant 0 : index
    %c0_89 = arith.constant 0 : index
    %c0_90 = arith.constant 0 : index
    %139 = vector.load %arg10[%c0_88, %c0_89, %c0_90] : memref<4x16x3xf32, #tpu.memory_space<vmem>>, vector<1x16x3xf32>
    %140 = vector.shape_cast %139 : vector<1x16x3xf32> to vector<16x3xf32>
    %cst_91 = arith.constant dense<0.000000e+00> : vector<256x3xf32>
    %141 = tpu.matmul %137, %140, %cst_91 {dimension_numbers = #tpu.dot_dimension_numbers<[1], [0], [0], [1], [0, 0, 1, 1], [], []>} : vector<256x16xf32>, vector<16x3xf32>, vector<256x3xf32> -> vector<256x3xf32>
    %142 = vector.broadcast %138 : vector<1x3xf32> to vector<256x3xf32>
    %143 = arith.addf %141, %142 : vector<256x3xf32>
    %cst_92 = arith.constant 0.000000e+00 : f32
    %144 = vector.broadcast %cst_92 : f32 to vector<256x3xf32>
    %145 = arith.maximumf %143, %144 : vector<256x3xf32>
    %c1_93 = arith.constant 1 : index
    %c0_94 = arith.constant 0 : index
    %c0_95 = arith.constant 0 : index
    %146 = vector.load %arg10[%c1_93, %c0_94, %c0_95] : memref<4x16x3xf32, #tpu.memory_space<vmem>>, vector<1x16x3xf32>
    %147 = vector.shape_cast %146 : vector<1x16x3xf32> to vector<16x3xf32>
    %cst_96 = arith.constant dense<0.000000e+00> : vector<256x3xf32>
    %148 = tpu.matmul %137, %147, %cst_96 {dimension_numbers = #tpu.dot_dimension_numbers<[1], [0], [0], [1], [0, 0, 1, 1], [], []>} : vector<256x16xf32>, vector<16x3xf32>, vector<256x3xf32> -> vector<256x3xf32>
    %149 = vector.broadcast %138 : vector<1x3xf32> to vector<256x3xf32>
    %150 = arith.addf %148, %149 : vector<256x3xf32>
    %cst_97 = arith.constant 0.000000e+00 : f32
    %151 = vector.broadcast %cst_97 : f32 to vector<256x3xf32>
    %152 = arith.maximumf %150, %151 : vector<256x3xf32>
    %c2_98 = arith.constant 2 : index
    %c0_99 = arith.constant 0 : index
    %c0_100 = arith.constant 0 : index
    %153 = vector.load %arg10[%c2_98, %c0_99, %c0_100] : memref<4x16x3xf32, #tpu.memory_space<vmem>>, vector<1x16x3xf32>
    %154 = vector.shape_cast %153 : vector<1x16x3xf32> to vector<16x3xf32>
    %cst_101 = arith.constant dense<0.000000e+00> : vector<256x3xf32>
    %155 = tpu.matmul %137, %154, %cst_101 {dimension_numbers = #tpu.dot_dimension_numbers<[1], [0], [0], [1], [0, 0, 1, 1], [], []>} : vector<256x16xf32>, vector<16x3xf32>, vector<256x3xf32> -> vector<256x3xf32>
    %156 = vector.broadcast %138 : vector<1x3xf32> to vector<256x3xf32>
    %157 = arith.addf %155, %156 : vector<256x3xf32>
    %cst_102 = arith.constant 0.000000e+00 : f32
    %158 = vector.broadcast %cst_102 : f32 to vector<256x3xf32>
    %159 = arith.maximumf %157, %158 : vector<256x3xf32>
    %c3_103 = arith.constant 3 : index
    %c0_104 = arith.constant 0 : index
    %c0_105 = arith.constant 0 : index
    %160 = vector.load %arg10[%c3_103, %c0_104, %c0_105] : memref<4x16x3xf32, #tpu.memory_space<vmem>>, vector<1x16x3xf32>
    %161 = vector.shape_cast %160 : vector<1x16x3xf32> to vector<16x3xf32>
    %cst_106 = arith.constant dense<0.000000e+00> : vector<256x3xf32>
    %162 = tpu.matmul %137, %161, %cst_106 {dimension_numbers = #tpu.dot_dimension_numbers<[1], [0], [0], [1], [0, 0, 1, 1], [], []>} : vector<256x16xf32>, vector<16x3xf32>, vector<256x3xf32> -> vector<256x3xf32>
    %163 = vector.broadcast %138 : vector<1x3xf32> to vector<256x3xf32>
    %164 = arith.addf %162, %163 : vector<256x3xf32>
    %cst_107 = arith.constant 0.000000e+00 : f32
    %165 = vector.broadcast %cst_107 : f32 to vector<256x3xf32>
    %166 = arith.maximumf %164, %165 : vector<256x3xf32>
    %167 = vector.shape_cast %145 : vector<256x3xf32> to vector<1x256x3xf32>
    %168 = vector.shape_cast %152 : vector<256x3xf32> to vector<1x256x3xf32>
    %169 = vector.shape_cast %159 : vector<256x3xf32> to vector<1x256x3xf32>
    %170 = vector.shape_cast %166 : vector<256x3xf32> to vector<1x256x3xf32>
    %171 = tpu.concatenate %167, %168, %169, %170 in 0 : vector<1x256x3xf32>, vector<1x256x3xf32>, vector<1x256x3xf32>, vector<1x256x3xf32> -> vector<4x256x3xf32>
    %172 = vector.shape_cast %171 : vector<4x256x3xf32> to vector<1024x3xf32>
    %c0_108 = arith.constant 0 : index
    %c0_109 = arith.constant 0 : index
    %c0_110 = arith.constant 0 : index
    %173 = vector.load %arg12[%c0_108, %c0_109, %c0_110] : memref<1x1024x3xf32, #tpu.memory_space<vmem>>, vector<1x1024x3xf32>
    %174 = vector.shape_cast %173 : vector<1x1024x3xf32> to vector<1024x3xf32>
    %175 = vector.shape_cast %172 : vector<1024x3xf32> to vector<1x1024x3xf32>
    tpu.vector_store %arg12[%c0_108, %c0_109, %c0_110], %175 {strides = array<i32>} : memref<1x1024x3xf32, #tpu.memory_space<vmem>>, vector<1x1024x3xf32>,
    return
  }
  func.func @transform_0(%arg0: i32) -> (i32, i32, i32) {
    %c0_i32 = arith.constant 0 : i32
    %c0_i32_0 = arith.constant 0 : i32
    %c0_i32_1 = arith.constant 0 : i32
    return %arg0, %c0_i32, %c0_i32_0 : i32, i32, i32
  }
  func.func @transform_1(%arg0: i32) -> (i32, i32, i32) {
    %c0_i32 = arith.constant 0 : i32
    %c0_i32_0 = arith.constant 0 : i32
    %c0_i32_1 = arith.constant 0 : i32
    %c0_i32_2 = arith.constant 0 : i32
    return %c0_i32, %c0_i32_0, %c0_i32_1 : i32, i32, i32
  }
  func.func @transform_2(%arg0: i32) -> (i32, i32) {
    %c0_i32 = arith.constant 0 : i32
    %c0_i32_0 = arith.constant 0 : i32
    %c0_i32_1 = arith.constant 0 : i32
    return %c0_i32, %c0_i32_0 : i32, i32
  }
  func.func @transform_3(%arg0: i32) -> (i32, i32, i32) {
    %c0_i32 = arith.constant 0 : i32
    %c0_i32_0 = arith.constant 0 : i32
    %c0_i32_1 = arith.constant 0 : i32
    %c0_i32_2 = arith.constant 0 : i32
    return %c0_i32, %c0_i32_0, %c0_i32_1 : i32, i32, i32
  }
  func.func @transform_4(%arg0: i32) -> (i32, i32) {
    %c0_i32 = arith.constant 0 : i32
    %c0_i32_0 = arith.constant 0 : i32
    %c0_i32_1 = arith.constant 0 : i32
    return %c0_i32, %c0_i32_0 : i32, i32
  }
  func.func @transform_5(%arg0: i32) -> (i32, i32, i32) {
    %c0_i32 = arith.constant 0 : i32
    %c0_i32_0 = arith.constant 0 : i32
    %c0_i32_1 = arith.constant 0 : i32
    %c0_i32_2 = arith.constant 0 : i32
    return %c0_i32, %c0_i32_0, %c0_i32_1 : i32, i32, i32
  }
  func.func @transform_6(%arg0: i32) -> (i32, i32) {
    %c0_i32 = arith.constant 0 : i32
    %c0_i32_0 = arith.constant 0 : i32
    %c0_i32_1 = arith.constant 0 : i32
    return %c0_i32, %c0_i32_0 : i32, i32
  }
  func.func @transform_7(%arg0: i32) -> (i32, i32, i32) {
    %c0_i32 = arith.constant 0 : i32
    %c0_i32_0 = arith.constant 0 : i32
    %c0_i32_1 = arith.constant 0 : i32
    %c0_i32_2 = arith.constant 0 : i32
    return %c0_i32, %c0_i32_0, %c0_i32_1 : i32, i32, i32
  }
  func.func @transform_8(%arg0: i32) -> (i32, i32) {
    %c0_i32 = arith.constant 0 : i32
    %c0_i32_0 = arith.constant 0 : i32
    %c0_i32_1 = arith.constant 0 : i32
    return %c0_i32, %c0_i32_0 : i32, i32
  }
  func.func @transform_9(%arg0: i32) -> (i32, i32, i32) {
    %c0_i32 = arith.constant 0 : i32
    %c0_i32_0 = arith.constant 0 : i32
    %c0_i32_1 = arith.constant 0 : i32
    %c0_i32_2 = arith.constant 0 : i32
    return %c0_i32, %c0_i32_0, %c0_i32_1 : i32, i32, i32
  }
  func.func @transform_10(%arg0: i32) -> (i32, i32) {
    %c0_i32 = arith.constant 0 : i32
    %c0_i32_0 = arith.constant 0 : i32
    %c0_i32_1 = arith.constant 0 : i32
    return %c0_i32, %c0_i32_0 : i32, i32
  }
  func.func @transform_11(%arg0: i32) -> (i32, i32, i32) {
    %c0_i32 = arith.constant 0 : i32
    %c0_i32_0 = arith.constant 0 : i32
    %c0_i32_1 = arith.constant 0 : i32
    return %arg0, %c0_i32, %c0_i32_0 : i32, i32, i32
  }
}

</mosaic_0001>

<bundles_post_ra>
// kernel: tpu_custom_call.1
= control target key start
LH: loop header
LB: loop body
LE: loop exit
PB: predicated region body
PF: predicated region fallthrough
CT: control target
= control target key end

     0   :  { %s5098_s17 = smov 0   ;;  %s6749_s0 = inlined_call_operand.vmem [shape: f32[2,1,256], index: 0, kind: input, shape index: {}]   ;;  %s6750_s1 = inlined_call_operand.vmem [shape: f32[4,256,128], index: 1, kind: input, shape index: {}]   ;;  %s6751_s2 = inlined_call_operand.vmem [shape: f32[1,128], index: 2, kind: input, shape index: {}]   ;;  %s6752_s3 = inlined_call_operand.vmem [shape: f32[4,128,64], index: 3, kind: input, shape index: {}]   ;;  %s6753_s4 = inlined_call_operand.vmem [shape: f32[1,64], index: 4, kind: input, shape index: {}]   ;;  %s6754_s5 = inlined_call_operand.vmem [shape: f32[4,64,32], index: 5, kind: input, shape index: {}]   ;;  %s6755_s6 = inlined_call_operand.vmem [shape: f32[1,32], index: 6, kind: input, shape index: {}]   ;;  %s6756_s7 = inlined_call_operand.vmem [shape: f32[4,32,16], index: 7, kind: input, shape index: {}]   ;;  %s6757_s8 = inlined_call_operand.vmem [shape: f32[1,16], index: 8, kind: input, shape index: {}]   ;;  %s6758_s9 = inlined_call_operand.vmem [shape: f32[4,16,3], index: 9, kind: input, shape index: {}]   ;;  %s6759_s10 = inlined_call_operand.vmem [shape: f32[1,3], index: 10, kind: input, shape index: {}]   ;;  %s6760_s11 = inlined_call_operand.vmem [shape: f32[2,1024,3], index: 11, kind: output, shape index: {}]  }
   0x1 LB: > { %s3375_s18 = sadd.s32 4294967295, %s5033_s17   ;;  %p3379_p0 = scmp.ge.s32.totalorder %s5033_s17, 1  ;;  %s5033_s17 = sphi %s5098_s17, %s21_s17  }
   0x2   : > { %p336_p1 = scmp.lt.s32.totalorder %s5033_s17, 3 }
   0x4   : > { %p337_p2 = pnand %p3379_p0, %p336_p1 }
   0x5   : > { %v402_v0 = vld [vmem:[%s6750_s1 + $0x80] sm:$0xff] (!%p337_p2)  ;;  %v403_v1 = vld [vmem:[%s6750_s1 + $0x88] sm:$0xff] (!%p337_p2)  ;;  %v404_v11 = vld [vmem:[%s6750_s1 + $0x90] sm:$0xff] (!%p337_p2)  ;;  %p5180_p3 = scmp.lt.s32.totalorder (!%p337_p2), %s3375_s18, 1  ;;  %v419_v47 = vlaneseq (!%p337_p2)  ;;  %vm5036_vm0 = vmmov (!%p337_p2), 0   ;;  %vm840_vm1 = vcmask (!%p337_p2), 1041409  }
   0x6   : > { %340 = sbr.rel (%p337_p2) target bundleno = 1332 (0x534), region = 64  ;;  %v3399_v2 = vld [vmem:[%s6750_s1 + $0x180] sm:$0xff] (!%p337_p2)  ;;  %v4680_v3 = vpack.c.bf16 (!%p337_p2), %v403_v1, %v402_v0  ;;  %v3400_v4 = vld [vmem:[%s6750_s1 + $0x188] sm:$0xff] (!%p337_p2)  ;;  %v405_v13 = vld [vmem:[%s6750_s1 + $0x98] sm:$0xff] (!%p337_p2)  ;;  %vm843_vm2 = vcmask (!%p337_p2), 1042434   ;;  %vm846_vm3 = vcmask (!%p337_p2), 1043459  }
   0x7   : > { %v386_v5 = vld [vmem:[%s6750_s1] sm:$0xff] (!%p337_p2)  ;;  %v387_v6 = vld [vmem:[%s6750_s1 + $0x8] sm:$0xff] (!%p337_p2)  ;;  %v4712_v7 = vpack.c.bf16 (!%p337_p2), %v3400_v4, %v3399_v2  ;;  %v3401_v14 = vld [vmem:[%s6750_s1 + $0x190] sm:$0xff] (!%p337_p2)  ;;  %v4684_v16 = vpack.c.bf16 (!%p337_p2), %v405_v13, %v404_v11  ;;  %v5244_v61 = vshrl.u32 (!%p337_p2), %v419_v47, 7  ;;  %vm1205_vm4 = vcmask (!%p337_p2), 523264  }
   0x8   : > { %v4682_v8 = vpack.c.bf16 (!%p337_p2), %v387_v6, %v386_v5  ;;  %v3383_v9 = vld [vmem:[%s6750_s1 + $0x100] sm:$0xff] (!%p337_p2)  ;;  %v3384_v10 = vld [vmem:[%s6750_s1 + $0x108] sm:$0xff] (!%p337_p2)  ;;  %4681 = vmatprep.subr.bf16.mxu0 (!%p337_p2), %v4680_v3  ;;  %v3402_v15 = vld [vmem:[%s6750_s1 + $0x198] sm:$0xff] (!%p337_p2)  ;;  %vm1556_vm5 = vcmask (!%p337_p2), 261120   ;;  %vm2057_vm6 = vcmask (!%p337_p2), 130048   ;;  %vm3191_vm7 = vcmask (!%p337_p2), 23552  }
   0x9   : > { %v4714_v12 = vpack.c.bf16 (!%p337_p2), %v3384_v10, %v3383_v9  ;;  %4713 = vmatprep.subr.bf16.mxu1 (!%p337_p2), %v4712_v7  ;;  %v4716_v17 = vpack.c.bf16 (!%p337_p2), %v3402_v15, %v3401_v14  ;;  %v388_v18 = vld [vmem:[%s6750_s1 + $0x10] sm:$0xff] (!%p337_p2)  ;;  %v389_v19 = vld [vmem:[%s6750_s1 + $0x18] sm:$0xff] (!%p337_p2)  ;;  %v406_v23 = vld [vmem:[%s6750_s1 + $0xa0] sm:$0xff] (!%p337_p2)  ;;  %v425_v10 = vsub.s32 (!%p337_p2), 1, %v5244_v61 }
   0xa   : > { %4683 = vmatpush3.bf16.msra.mxu0 (!%p337_p2), %v4682_v8  ;;  %v3385_v20 = vld [vmem:[%s6750_s1 + $0x110] sm:$0xff] (!%p337_p2)  ;;  %v4686_v21 = vpack.c.bf16 (!%p337_p2), %v389_v19, %v388_v18  ;;  %v3386_v22 = vld [vmem:[%s6750_s1 + $0x118] sm:$0xff] (!%p337_p2)  ;;  %v407_v24 = vld [vmem:[%s6750_s1 + $0xa8] sm:$0xff] (!%p337_p2) }
   0xb   : > { %4715 = vmatpush3.bf16.msra.mxu1 (!%p337_p2), %v4714_v12  ;;  %4685 = vmatprep.subr.bf16.mxu0 (!%p337_p2), %v4684_v16  ;;  %v4718_v25 = vpack.c.bf16 (!%p337_p2), %v3386_v22, %v3385_v20  ;;  %v4688_v26 = vpack.c.bf16 (!%p337_p2), %v407_v24, %v406_v23  ;;  %v3403_v27 = vld [vmem:[%s6750_s1 + $0x1a0] sm:$0xff] (!%p337_p2)  ;;  %v3404_v28 = vld [vmem:[%s6750_s1 + $0x1a8] sm:$0xff] (!%p337_p2)  ;;  %v408_v35 = vld [vmem:[%s6750_s1 + $0xb0] sm:$0xff] (!%p337_p2) }
   0xc   : > { %4717 = vmatprep.subr.bf16.mxu1 (!%p337_p2), %v4716_v17  ;;  %v390_v29 = vld [vmem:[%s6750_s1 + $0x20] sm:$0xff] (!%p337_p2)  ;;  %v4720_v30 = vpack.c.bf16 (!%p337_p2), %v3404_v28, %v3403_v27  ;;  %v391_v31 = vld [vmem:[%s6750_s1 + $0x28] sm:$0xff] (!%p337_p2)  ;;  %v409_v36 = vld [vmem:[%s6750_s1 + $0xb8] sm:$0xff] (!%p337_p2) }
   0xd   : > { %v3387_v32 = vld [vmem:[%s6750_s1 + $0x120] sm:$0xff]  ;;  %v3388_v33 = vld [vmem:[%s6750_s1 + $0x128] sm:$0xff]  ;;  %v4690_v34 = vpack.c.bf16 %v391_v31, %v390_v29  ;;  %v3405_v37 = vld [vmem:[%s6750_s1 + $0x1b0] sm:$0xff]  ;;  %v4692_v39 = vpack.c.bf16 %v409_v36, %v408_v35  ;;  %s6763_s18 = smov (!%p5180_p3, %s3375_s18), 1 }
   0xe   : > { %4687 = vmatpush3.bf16.msra.mxu0 %v4686_v21  ;;  %v4722_v38 = vpack.c.bf16 %v3388_v33, %v3387_v32  ;;  %v3406_v40 = vld [vmem:[%s6750_s1 + $0x1b8] sm:$0xff]  ;;  %v392_v41 = vld [vmem:[%s6750_s1 + $0x30] sm:$0xff]  ;;  %v410_v46 = vld [vmem:[%s6750_s1 + $0xc0] sm:$0xff]  ;;  %s3380_s24 = sshll.u32 %s6763_s18, 1  ;;  %s3743_s21 = sshll.u32 %s6763_s18, 10 }
   0xf   : > { %4719 = vmatpush3.bf16.msra.mxu1 %v4718_v25  ;;  %4689 = vmatprep.subr.bf16.mxu0 %v4688_v26  ;;  %v393_v42 = vld [vmem:[%s6750_s1 + $0x38] sm:$0xff]  ;;  %v4724_v43 = vpack.c.bf16 %v3406_v40, %v3405_v37  ;;  %v3389_v44 = vld [vmem:[%s6750_s1 + $0x130] sm:$0xff]  ;;  %v411_v48 = vld [vmem:[%s6750_s1 + $0xc8] sm:$0xff]  ;;  %s378_s22 = scalar_lea.vmem %s6749_s0, %s3380_s24  ;;  %v421_v37 = vsub.s32 0, %v5244_v61 }
  0x10   : > { %4721 = vmatprep.subr.bf16.mxu1 %v4720_v30  ;;  %v3390_v45 = vld [vmem:[%s6750_s1 + $0x138] sm:$0xff]  ;;  %v3407_v49 = vld [vmem:[%s6750_s1 + $0x1c0] sm:$0xff]  ;;  %v3408_v50 = vld [vmem:[%s6750_s1 + $0x1c8] sm:$0xff]  ;;  %v4694_v51 = vpack.c.bf16 %v393_v42, %v392_v41  ;;  %v4696_v53 = vpack.c.bf16 %v411_v48, %v410_v46 }
  0x11   : > { %v4726_v52 = vpack.c.bf16 %v3390_v45, %v3389_v44  ;;  %v394_v54 = vld [vmem:[%s6750_s1 + $0x40] sm:$0xff]  ;;  %v395_v55 = vld [vmem:[%s6750_s1 + $0x48] sm:$0xff]  ;;  %v4728_v57 = vpack.c.bf16 %v3408_v50, %v3407_v49  ;;  %v412_v59 = vld [vmem:[%s6750_s1 + $0xd0] sm:$0xff] }
  0x12   : > { %4691 = vmatpush3.bf16.msra.mxu0 %v4690_v34  ;;  %v3391_v56 = vld [vmem:[%s6750_s1 + $0x140] sm:$0xff]  ;;  %v3392_v58 = vld [vmem:[%s6750_s1 + $0x148] sm:$0xff]  ;;  %v413_v60 = vld [vmem:[%s6750_s1 + $0xd8] sm:$0xff]  ;;  %v4698_v0 = vpack.c.bf16 %v395_v55, %v394_v54 }
  0x13   : > { %4723 = vmatpush3.bf16.msra.mxu1 %v4722_v38  ;;  %4693 = vmatprep.subr.bf16.mxu0 %v4692_v39  ;;  %v3409_v62 = vld [vmem:[%s6750_s1 + $0x1d0] sm:$0xff]  ;;  %v3410_v63 = vld [vmem:[%s6750_s1 + $0x1d8] sm:$0xff]  ;;  %v4730_v1 = vpack.c.bf16 %v3392_v58, %v3391_v56  ;;  %v4700_v2 = vpack.c.bf16 %v413_v60, %v412_v59  ;;  %v414_v8 = vld [vmem:[%s6750_s1 + $0xe0] sm:$0xff] }
  0x14   : > { %4725 = vmatprep.subr.bf16.mxu1 %v4724_v43  ;;  %v396_v3 = vld [vmem:[%s6750_s1 + $0x50] sm:$0xff]  ;;  %v397_v4 = vld [vmem:[%s6750_s1 + $0x58] sm:$0xff]  ;;  %v4732_v6 = vpack.c.bf16 %v3410_v63, %v3409_v62  ;;  %v415_v9 = vld [vmem:[%s6750_s1 + $0xe8] sm:$0xff] }
  0x15   : > { %v3393_v5 = vld [vmem:[%s6750_s1 + $0x150] sm:$0xff]  ;;  %v3394_v7 = vld [vmem:[%s6750_s1 + $0x158] sm:$0xff]  ;;  %v3411_v11 = vld [vmem:[%s6750_s1 + $0x1e0] sm:$0xff]  ;;  %v4702_v13 = vpack.c.bf16 %v397_v4, %v396_v3  ;;  %v4704_v16 = vpack.c.bf16 %v415_v9, %v414_v8 }
  0x16   : > { %4695 = vmatpush3.bf16.msra.mxu0 %v4694_v51  ;;  %v3412_v12 = vld [vmem:[%s6750_s1 + $0x1e8] sm:$0xff]  ;;  %v398_v14 = vld [vmem:[%s6750_s1 + $0x60] sm:$0xff]  ;;  %v4734_v15 = vpack.c.bf16 %v3394_v7, %v3393_v5  ;;  %v416_v22 = vld [vmem:[%s6750_s1 + $0xf0] sm:$0xff] }
  0x17   : > { %4727 = vmatpush3.bf16.msra.mxu1 %v4726_v52  ;;  %4697 = vmatprep.subr.bf16.mxu0 %v4696_v53  ;;  %v399_v17 = vld [vmem:[%s6750_s1 + $0x68] sm:$0xff]  ;;  %v3395_v18 = vld [vmem:[%s6750_s1 + $0x160] sm:$0xff]  ;;  %v4736_v20 = vpack.c.bf16 %v3412_v12, %v3411_v11  ;;  %v417_v23 = vld [vmem:[%s6750_s1 + $0xf8] sm:$0xff] }
  0x18   : > { %4729 = vmatprep.subr.bf16.mxu1 %v4728_v57  ;;  %v384_v19 = vld [vmem:[%s378_s22] sm:$0x3]  ;;  %v3396_v21 = vld [vmem:[%s6750_s1 + $0x168] sm:$0xff]  ;;  %v3413_v25 = vld [vmem:[%s6750_s1 + $0x1f0] sm:$0xff]  ;;  %v4706_v27 = vpack.c.bf16 %v399_v17, %v398_v14  ;;  %v4708_v29 = vpack.c.bf16 %v417_v23, %v416_v22  ;;  %s6362_s22 = scalar_lea.vmem %s6760_s11, %s3743_s21 }
  0x19   : > { %v5299_v24 = vrot.slane %v384_v19, %v425_v10  ;;  %v3414_v26 = vld [vmem:[%s6750_s1 + $0x1f8] sm:$0xff]  ;;  %v4738_v28 = vpack.c.bf16 %v3396_v21, %v3395_v18  ;;  %v400_v30 = vld [vmem:[%s6750_s1 + $0x70] sm:$0xff]  ;;  %v3431_v35 = vld [vmem:[%s6750_s1 + $0x280] sm:$0xff]  ;;  %v5352_v50 = vrot.slane %v384_v19, %v421_v37 }
  0x1a   : > { %4699 = vmatpush3.bf16.msra.mxu0 %v4698_v0  ;;  %v401_v31 = vld [vmem:[%s6750_s1 + $0x78] sm:$0xff]  ;;  %v3397_v32 = vld [vmem:[%s6750_s1 + $0x170] sm:$0xff]  ;;  %v4740_v33 = vpack.c.bf16 %v3414_v26, %v3413_v25  ;;  %v3432_v36 = vld [vmem:[%s6750_s1 + $0x288] sm:$0xff] }
  0x1b   : > { %4731 = vmatpush3.bf16.msra.mxu1 %v4730_v1  ;;  %4701 = vmatprep.subr.bf16.mxu0 %v4700_v2  ;;  %v3398_v34 = vld [vmem:[%s6750_s1 + $0x178] sm:$0xff]  ;;  %v3463_v38 = vld [vmem:[%s6750_s1 + $0x380] sm:$0xff]  ;;  %v3464_v39 = vld [vmem:[%s6750_s1 + $0x388] sm:$0xff]  ;;  %v4710_v40 = vpack.c.bf16 %v401_v31, %v400_v30  ;;  %v4744_v42 = vpack.c.bf16 %v3432_v36, %v3431_v35 }
  0x1c   : > { %4733 = vmatprep.subr.bf16.mxu1 %v4732_v6  ;;  %493 = vmatprep.mubr.f32.mxu0 %v5299_v24  ;;  %v4742_v41 = vpack.c.bf16 %v3398_v34, %v3397_v32  ;;  %v3415_v43 = vld [vmem:[%s6750_s1 + $0x200] sm:$0xff]  ;;  %v3416_v44 = vld [vmem:[%s6750_s1 + $0x208] sm:$0xff]  ;;  %v4776_v46 = vpack.c.bf16 %v3464_v39, %v3463_v38  ;;  %v3433_v48 = vld [vmem:[%s6750_s1 + $0x290] sm:$0xff] }
  0x1d   : > { %597 = vmatprep.mubr.f32.mxu1 %v5299_v24  ;;  %v3447_v45 = vld [vmem:[%s6750_s1 + $0x300] sm:$0xff]  ;;  %v3448_v47 = vld [vmem:[%s6750_s1 + $0x308] sm:$0xff]  ;;  %v3434_v49 = vld [vmem:[%s6750_s1 + $0x298] sm:$0xff]  ;;  %v4746_v53 = vpack.c.bf16 %v3416_v44, %v3415_v43 }
  0x1e   : > { %4703 = vmatpush3.bf16.msra.mxu0 %v4702_v13  ;;  %v3465_v51 = vld [vmem:[%s6750_s1 + $0x390] sm:$0xff]  ;;  %v3466_v52 = vld [vmem:[%s6750_s1 + $0x398] sm:$0xff]  ;;  %v4778_v54 = vpack.c.bf16 %v3448_v47, %v3447_v45  ;;  %v4748_v55 = vpack.c.bf16 %v3434_v49, %v3433_v48  ;;  %v3435_v61 = vld [vmem:[%s6750_s1 + $0x2a0] sm:$0xff] }
  0x1f   : > { %4735 = vmatpush3.bf16.msra.mxu1 %v4734_v15  ;;  %4705 = vmatprep.subr.bf16.mxu0 %v4704_v16  ;;  %v3417_v56 = vld [vmem:[%s6750_s1 + $0x210] sm:$0xff]  ;;  %v3418_v57 = vld [vmem:[%s6750_s1 + $0x218] sm:$0xff]  ;;  %v4780_v59 = vpack.c.bf16 %v3466_v52, %v3465_v51  ;;  %v3436_v62 = vld [vmem:[%s6750_s1 + $0x2a8] sm:$0xff] }
  0x20   : > { %4737 = vmatprep.subr.bf16.mxu1 %v4736_v20  ;;  %v3449_v58 = vld [vmem:[%s6750_s1 + $0x310] sm:$0xff]  ;;  %v3450_v60 = vld [vmem:[%s6750_s1 + $0x318] sm:$0xff]  ;;  %v3467_v63 = vld [vmem:[%s6750_s1 + $0x3a0] sm:$0xff]  ;;  %v4750_v1 = vpack.c.bf16 %v3418_v57, %v3417_v56  ;;  %v4752_v3 = vpack.c.bf16 %v3436_v62, %v3435_v61 }
  0x21   : > { %v3468_v0 = vld [vmem:[%s6750_s1 + $0x3a8] sm:$0xff]  ;;  %v4782_v2 = vpack.c.bf16 %v3450_v60, %v3449_v58  ;;  %v3419_v4 = vld [vmem:[%s6750_s1 + $0x220] sm:$0xff]  ;;  %v3437_v9 = vld [vmem:[%s6750_s1 + $0x2b0] sm:$0xff] }
  0x22   : > { %4707 = vmatpush3.bf16.msra.mxu0 %v4706_v27  ;;  %v3420_v5 = vld [vmem:[%s6750_s1 + $0x228] sm:$0xff]  ;;  %v3451_v6 = vld [vmem:[%s6750_s1 + $0x320] sm:$0xff]  ;;  %v4784_v7 = vpack.c.bf16 %v3468_v0, %v3467_v63  ;;  %v3438_v10 = vld [vmem:[%s6750_s1 + $0x2b8] sm:$0xff] }
  0x23   : > { %4739 = vmatpush3.bf16.msra.mxu1 %v4738_v28  ;;  %4709 = vmatprep.subr.bf16.mxu0 %v4708_v29  ;;  %v3452_v8 = vld [vmem:[%s6750_s1 + $0x328] sm:$0xff]  ;;  %v3469_v11 = vld [vmem:[%s6750_s1 + $0x3b0] sm:$0xff]  ;;  %v3470_v12 = vld [vmem:[%s6750_s1 + $0x3b8] sm:$0xff]  ;;  %v4754_v13 = vpack.c.bf16 %v3420_v5, %v3419_v4  ;;  %v4756_v15 = vpack.c.bf16 %v3438_v10, %v3437_v9 }
  0x24   : > { %4741 = vmatprep.subr.bf16.mxu1 %v4740_v33  ;;  %v4786_v14 = vpack.c.bf16 %v3452_v8, %v3451_v6  ;;  %v3421_v16 = vld [vmem:[%s6750_s1 + $0x230] sm:$0xff]  ;;  %v3422_v17 = vld [vmem:[%s6750_s1 + $0x238] sm:$0xff]  ;;  %v4788_v19 = vpack.c.bf16 %v3470_v12, %v3469_v11  ;;  %v3439_v21 = vld [vmem:[%s6750_s1 + $0x2c0] sm:$0xff]  ;;  %v5035_v11 = vmov 0.0|0.0  }
  0x25   : > { %v3453_v18 = vld [vmem:[%s6750_s1 + $0x330] sm:$0xff]  ;;  %v3454_v20 = vld [vmem:[%s6750_s1 + $0x338] sm:$0xff]  ;;  %v3440_v22 = vld [vmem:[%s6750_s1 + $0x2c8] sm:$0xff]  ;;  %v4758_v25 = vpack.c.bf16 %v3422_v17, %v3421_v16 }
  0x26   : > { %4711 = vmatpush3.bf16.msra.mxu0 %v4710_v40  ;;  %v3471_v23 = vld [vmem:[%s6750_s1 + $0x3c0] sm:$0xff]  ;;  %v4790_v26 = vpack.c.bf16 %v3454_v20, %v3453_v18  ;;  %v4760_v27 = vpack.c.bf16 %v3440_v22, %v3439_v21  ;;  %v3424_v29 = vld [vmem:[%s6750_s1 + $0x248] sm:$0xff]  ;;  %v3441_v33 = vld [vmem:[%s6750_s1 + $0x2d0] sm:$0xff] }
  0x27   : > { %4743 = vmatpush3.bf16.msra.mxu1 %v4742_v41  ;;  %4745 = vmatprep.subr.bf16.mxu0 %v4744_v42  ;;  %v3423_v28 = vld [vmem:[%s6750_s1 + $0x240] sm:$0xff]  ;;  %v3456_v32 = vld [vmem:[%s6750_s1 + $0x348] sm:$0xff]  ;;  %v3442_v34 = vld [vmem:[%s6750_s1 + $0x2d8] sm:$0xff] }
  0x28   : > { %4777 = vmatprep.subr.bf16.mxu1 %v4776_v46  ;;  %v3455_v30 = vld [vmem:[%s6750_s1 + $0x340] sm:$0xff]  ;;  %v3473_v35 = vld [vmem:[%s6750_s1 + $0x3d0] sm:$0xff]  ;;  %v3474_v36 = vld [vmem:[%s6750_s1 + $0x3d8] sm:$0xff]  ;;  %v4762_v37 = vpack.c.bf16 %v3424_v29, %v3423_v28  ;;  %v4764_v39 = vpack.c.bf16 %v3442_v34, %v3441_v33 }
  0x29   : > { %494 = vmatmul.mubr.f32.vlgmr.msra.gmra.mrb[0].mxu0 %v5352_v50  ;;  %v4794_v38 = vpack.c.bf16 %v3456_v32, %v3455_v30  ;;  %v3425_v40 = vld [vmem:[%s6750_s1 + $0x250] sm:$0xff]  ;;  %v3426_v41 = vld [vmem:[%s6750_s1 + $0x258] sm:$0xff]  ;;  %v4796_v43 = vpack.c.bf16 %v3474_v36, %v3473_v35  ;;  %v3443_v45 = vld [vmem:[%s6750_s1 + $0x2e0] sm:$0xff] }
  0x2a   : > { %598 = vmatmul.mubr.f32.vlgmr.msra.gmra.mrb[0].mxu1 %v5352_v50  ;;  %4747 = vmatpush3.bf16.msra.mxu0 %v4746_v53  ;;  %v3457_v42 = vld [vmem:[%s6750_s1 + $0x350] sm:$0xff]  ;;  %v3458_v44 = vld [vmem:[%s6750_s1 + $0x358] sm:$0xff]  ;;  %v3444_v46 = vld [vmem:[%s6750_s1 + $0x2e8] sm:$0xff]  ;;  %v4766_v49 = vpack.c.bf16 %v3426_v41, %v3425_v40 }
  0x2b   : > { %4779 = vmatpush3.bf16.msra.mxu1 %v4778_v54  ;;  %4749 = vmatprep.subr.bf16.mxu0 %v4748_v55  ;;  %v3475_v47 = vld [vmem:[%s6750_s1 + $0x3e0] sm:$0xff]  ;;  %v3476_v48 = vld [vmem:[%s6750_s1 + $0x3e8] sm:$0xff]  ;;  %v4798_v51 = vpack.c.bf16 %v3458_v44, %v3457_v42  ;;  %v4768_v52 = vpack.c.bf16 %v3444_v46, %v3443_v45  ;;  %v3445_v58 = vld [vmem:[%s6750_s1 + $0x2f0] sm:$0xff] }
  0x2c   : > { %4781 = vmatprep.subr.bf16.mxu1 %v4780_v59  ;;  %701 = vmatprep.mubr.f32.mxu0 %v5299_v24  ;;  %v3427_v53 = vld [vmem:[%s6750_s1 + $0x260] sm:$0xff]  ;;  %v3428_v54 = vld [vmem:[%s6750_s1 + $0x268] sm:$0xff]  ;;  %v4800_v56 = vpack.c.bf16 %v3476_v48, %v3475_v47  ;;  %v3446_v59 = vld [vmem:[%s6750_s1 + $0x2f8] sm:$0xff] }
  0x2d   : > { %805 = vmatprep.mubr.f32.mxu1 %v5299_v24  ;;  %v3472_v24 = vld [vmem:[%s6750_s1 + $0x3c8] sm:$0xff]  ;;  %v3459_v55 = vld [vmem:[%s6750_s1 + $0x360] sm:$0xff]  ;;  %v3477_v60 = vld [vmem:[%s6750_s1 + $0x3f0] sm:$0xff]  ;;  %v4770_v62 = vpack.c.bf16 %v3428_v54, %v3427_v53  ;;  %v4772_v0 = vpack.c.bf16 %v3446_v59, %v3445_v58 }
  0x2e   : > { %4751 = vmatpush3.bf16.msra.mxu0 %v4750_v1  ;;  %v4792_v31 = vpack.c.bf16 %v3472_v24, %v3471_v23  ;;  %v3460_v57 = vld [vmem:[%s6750_s1 + $0x368] sm:$0xff]  ;;  %v3478_v61 = vld [vmem:[%s6750_s1 + $0x3f8] sm:$0xff]  ;;  %v3429_v1 = vld [vmem:[%s6750_s1 + $0x270] sm:$0xff] }
  0x2f   : > { %4783 = vmatpush3.bf16.msra.mxu1 %v4782_v2  ;;  %4753 = vmatprep.subr.bf16.mxu0 %v4752_v3  ;;  %v4802_v63 = vpack.c.bf16 %v3460_v57, %v3459_v55  ;;  %v3430_v2 = vld [vmem:[%s6750_s1 + $0x278] sm:$0xff]  ;;  %v4804_v3 = vpack.c.bf16 %v3478_v61, %v3477_v60  ;;  %v3461_v4 = vld [vmem:[%s6750_s1 + $0x370] sm:$0xff]  ;;  %v813_v8 = vld [vmem:[%s6752_s3] sm:$0xff]  ;;  %v5037_v57 = vmov 0.0  }
  0x30   : > { %4785 = vmatprep.subr.bf16.mxu1 %v4784_v7  ;;  %v3462_v5 = vld [vmem:[%s6750_s1 + $0x378] sm:$0xff]  ;;  %v4774_v6 = vpack.c.bf16 %v3430_v2, %v3429_v1  ;;  %v814_v9 = vld [vmem:[%s6752_s3 + $0x8] sm:$0xff]  ;;  %v3480_v10 = vld [vmem:[%s6752_s3 + $0x80] sm:$0xff] }
  0x31   : > { %v4806_v7 = vpack.c.bf16 %v3462_v5, %v3461_v4  ;;  %v4809_v12 = vpack.c.bf16 %v814_v9, %v813_v8  ;;  %v3482_v16 = vld [vmem:[%s6752_s3 + $0x90] sm:$0xff]  ;;  %v3483_v17 = vld [vmem:[%s6752_s3 + $0x98] sm:$0xff]  ;;  %v817_v20 = vld [vmem:[%s6752_s3 + $0x20] sm:$0xff] }
  0x32   : > { %4755 = vmatpush3.bf16.msra.mxu0 %v4754_v13  ;;  %v815_v13 = vld [vmem:[%s6752_s3 + $0x10] sm:$0xff]  ;;  %v818_v21 = vld [vmem:[%s6752_s3 + $0x28] sm:$0xff]  ;;  %v3484_v22 = vld [vmem:[%s6752_s3 + $0xa0] sm:$0xff] }
  0x33   : > { %4787 = vmatpush3.bf16.msra.mxu1 %v4786_v14  ;;  %4757 = vmatprep.subr.bf16.mxu0 %v4756_v15  ;;  %v816_v14 = vld [vmem:[%s6752_s3 + $0x18] sm:$0xff]  ;;  %v3485_v23 = vld [vmem:[%s6752_s3 + $0xa8] sm:$0xff]  ;;  %v4815_v24 = vpack.c.bf16 %v818_v21, %v817_v20  ;;  %v3486_v28 = vld [vmem:[%s6752_s3 + $0xb0] sm:$0xff] }
  0x34   : > { %4789 = vmatprep.subr.bf16.mxu1 %v4788_v19  ;;  %v4812_v18 = vpack.c.bf16 %v816_v14, %v815_v13  ;;  %v4836_v19 = vpack.c.bf16 %v3483_v17, %v3482_v16  ;;  %v3487_v29 = vld [vmem:[%s6752_s3 + $0xb8] sm:$0xff]  ;;  %v821_v32 = vld [vmem:[%s6752_s3 + $0x40] sm:$0xff]  ;;  %v822_v33 = vld [vmem:[%s6752_s3 + $0x48] sm:$0xff] }
  0x35   : > { %v3488_v34 = vld [vmem:[%s6752_s3 + $0xc0] sm:$0xff]  ;;  %v3489_v35 = vld [vmem:[%s6752_s3 + $0xc8] sm:$0xff]  ;;  %v4821_v36 = vpack.c.bf16 %v822_v33, %v821_v32  ;;  %v3490_v40 = vld [vmem:[%s6752_s3 + $0xd0] sm:$0xff] }
  0x36   : > { %4759 = vmatpush3.bf16.msra.mxu0 %v4758_v25  ;;  %v4839_v25 = vpack.c.bf16 %v3485_v23, %v3484_v22  ;;  %v3491_v42 = vld [vmem:[%s6752_s3 + $0xd8] sm:$0xff]  ;;  %v825_v44 = vld [vmem:[%s6752_s3 + $0x60] sm:$0xff]  ;;  %v826_v45 = vld [vmem:[%s6752_s3 + $0x68] sm:$0xff] }
  0x37   : > { %4791 = vmatpush3.bf16.msra.mxu1 %v4790_v26  ;;  %4761 = vmatprep.subr.bf16.mxu0 %v4760_v27  ;;  %v819_v26 = vld [vmem:[%s6752_s3 + $0x30] sm:$0xff]  ;;  %v820_v27 = vld [vmem:[%s6752_s3 + $0x38] sm:$0xff]  ;;  %v3492_v46 = vld [vmem:[%s6752_s3 + $0xe0] sm:$0xff]  ;;  %v4827_v47 = vpack.c.bf16 %v826_v45, %v825_v44 }
  0x38   : > { %4793 = vmatprep.subr.bf16.mxu1 %v4792_v31  ;;  %v4818_v30 = vpack.c.bf16 %v820_v27, %v819_v26  ;;  %v4842_v31 = vpack.c.bf16 %v3487_v29, %v3486_v28  ;;  %v3493_v48 = vld [vmem:[%s6752_s3 + $0xe8] sm:$0xff]  ;;  %v3494_v53 = vld [vmem:[%s6752_s3 + $0xf0] sm:$0xff]  ;;  %v3495_v55 = vld [vmem:[%s6752_s3 + $0xf8] sm:$0xff] }
  0x39   : > { %v385_v61 = vld [vmem:[%s6751_s2] sm:$0x1]  ;;  %v3497_v17 = vld [vmem:[%s6752_s3 + $0x108] sm:$0xff]  ;;  %v3499_v27 = vld [vmem:[%s6752_s3 + $0x118] sm:$0xff] }
  0x3a   : > { %4763 = vmatpush3.bf16.msra.mxu0 %v4762_v37  ;;  %v4845_v37 = vpack.c.bf16 %v3489_v35, %v3488_v34  ;;  %v3514_v28 = vld [vmem:[%s6752_s3 + $0x190] sm:$0xff]  ;;  %v3515_v29 = vld [vmem:[%s6752_s3 + $0x198] sm:$0xff]  ;;  %v3500_v33 = vld [vmem:[%s6752_s3 + $0x120] sm:$0xff] }
  0x3b   : > { %4795 = vmatpush3.bf16.msra.mxu1 %v4794_v38  ;;  %4765 = vmatprep.subr.bf16.mxu0 %v4764_v39  ;;  %v823_v38 = vld [vmem:[%s6752_s3 + $0x50] sm:$0xff]  ;;  %v824_v39 = vld [vmem:[%s6752_s3 + $0x58] sm:$0xff]  ;;  %v4884_v32 = vpack.c.bf16 %v3515_v29, %v3514_v28  ;;  %v3501_v34 = vld [vmem:[%s6752_s3 + $0x128] sm:$0xff] }
  0x3c   : > { %4797 = vmatprep.subr.bf16.mxu1 %v4796_v43  ;;  %v4824_v41 = vpack.c.bf16 %v824_v39, %v823_v38  ;;  %v4848_v43 = vpack.c.bf16 %v3491_v42, %v3490_v40  ;;  %v3516_v35 = vld [vmem:[%s6752_s3 + $0x1a0] sm:$0xff]  ;;  %v3502_v39 = vld [vmem:[%s6752_s3 + $0x130] sm:$0xff]  ;;  %v3503_v40 = vld [vmem:[%s6752_s3 + $0x138] sm:$0xff] }
  0x3d   : > { %v3519_v42 = vld [vmem:[%s6752_s3 + $0x1b8] sm:$0xff]  ;;  %v3504_v45 = vld [vmem:[%s6752_s3 + $0x140] sm:$0xff] }
  0x3e   : > { %4767 = vmatpush3.bf16.msra.mxu0 %v4766_v49  ;;  %v4851_v49 = vpack.c.bf16 %v3493_v48, %v3492_v46  ;;  %v3505_v46 = vld [vmem:[%s6752_s3 + $0x148] sm:$0xff]  ;;  %v3541_v29 = vld [vmem:[%s6754_s5 + $0x80] sm:$0xff] }
  0x3f   : > { %4799 = vmatpush3.bf16.msra.mxu1 %v4798_v51  ;;  %4769 = vmatprep.subr.bf16.mxu0 %v4768_v52  ;;  %v827_v51 = vld [vmem:[%s6752_s3 + $0x70] sm:$0xff]  ;;  %v828_v52 = vld [vmem:[%s6752_s3 + $0x78] sm:$0xff]  ;;  %v3521_v48 = vld [vmem:[%s6752_s3 + $0x1c8] sm:$0xff] }
  0x40   : > { %4801 = vmatprep.subr.bf16.mxu1 %v4800_v56  ;;  %v4830_v54 = vpack.c.bf16 %v828_v52, %v827_v51  ;;  %v4854_v56 = vpack.c.bf16 %v3495_v55, %v3494_v53  ;;  %v3506_v52 = vld [vmem:[%s6752_s3 + $0x150] sm:$0xff]  ;;  %v3507_v53 = vld [vmem:[%s6752_s3 + $0x158] sm:$0xff] }
  0x41   : > { %v3523_v55 = vld [vmem:[%s6752_s3 + $0x1d8] sm:$0xff] }
  0x42   : > { %4771 = vmatpush3.bf16.msra.mxu0 %v4770_v62 }
  0x43   : > { %4803 = vmatpush3.bf16.msra.mxu1 %v4802_v63  ;;  %4773 = vmatprep.subr.bf16.mxu0 %v4772_v0 }
  0x44   : > { %4805 = vmatprep.subr.bf16.mxu1 %v4804_v3 }
  0x46   : > { %4775 = vmatpush3.bf16.msra.mxu0 %v4774_v6 }
  0x47   : > { %4807 = vmatpush3.bf16.msra.mxu1 %v4806_v7  ;;  %4808 = vmatprep.subr.bf16.mxu0 %v5035_v11 }
  0x48   : > { %4832 = vmatprep.subr.bf16.mxu1 %v5035_v11 }
  0x49   : > { %702 = vmatmul.mubr.f32.vlgmr.msra.gmra.mrb[2].mxu0 %v5352_v50 }
  0x4a   : > { %806 = vmatmul.mubr.f32.vlgmr.msra.gmra.mrb[2].mxu1 %v5352_v50  ;;  %v3481_v50 = vld [vmem:[%s6752_s3 + $0x88] sm:$0xff]  ;;  %4810 = vmatpush3.bf16.msra.mxu0 %v4809_v12 }
  0x4b   : > { %v4833_v15 = vpack.c.bf16 %v3481_v50, %v3480_v10  ;;  %4811 = vmatprep.subr.bf16.mxu0 %v5035_v11  ;;  %4208 = vmatprep.mubr.msk.f32.mxu0 %vm5036_vm0, %v5037_v57 }
  0x4c   : > { %4243 = vmatprep.mubr.msk.f32.mxu1 %vm5036_vm0, %v5037_v57 }
  0x4d   : > { %4834 = vmatpush3.bf16.msra.mxu1 %v4833_v15  ;;  %v3496_v15 = vld [vmem:[%s6752_s3 + $0x100] sm:$0xff] }
  0x4e   : > { %4835 = vmatprep.subr.bf16.mxu1 %v5035_v11  ;;  %4813 = vmatpush3.bf16.msra.mxu0 %v4812_v18  ;;  %v3512_v18 = vld [vmem:[%s6752_s3 + $0x180] sm:$0xff]  ;;  %v4857_v23 = vpack.c.bf16 %v3497_v17, %v3496_v15  ;;  %v3534_v15 = vld [vmem:[%s6754_s5 + $0x58] sm:$0xff] }
  0x4f   : > { %4814 = vmatprep.subr.bf16.mxu0 %v5035_v11 }
  0x51   : > { %4837 = vmatpush3.bf16.msra.mxu1 %v4836_v19  ;;  %v3513_v19 = vld [vmem:[%s6752_s3 + $0x188] sm:$0xff] }
  0x52   : > { %4838 = vmatprep.subr.bf16.mxu1 %v5035_v11  ;;  %4816 = vmatpush3.bf16.msra.mxu0 %v4815_v24  ;;  %v4881_v24 = vpack.c.bf16 %v3513_v19, %v3512_v18  ;;  %v1190_v18 = vld [vmem:[%s6754_s5 + $0x28] sm:$0xff]  ;;  %v3535_v19 = vld [vmem:[%s6754_s5 + $0x60] sm:$0xff] }
  0x53   : > { %4817 = vmatprep.subr.bf16.mxu0 %v5035_v11 }
  0x55   : > { %4840 = vmatpush3.bf16.msra.mxu1 %v4839_v25  ;;  %v3498_v25 = vld [vmem:[%s6752_s3 + $0x110] sm:$0xff] }
  0x56   : > { %4841 = vmatprep.subr.bf16.mxu1 %v5035_v11  ;;  %4819 = vmatpush3.bf16.msra.mxu0 %v4818_v30 }
  0x57   : > { %4820 = vmatprep.subr.bf16.mxu0 %v5035_v11 }
  0x59   : > { %4843 = vmatpush3.bf16.msra.mxu1 %v4842_v31  ;;  %v4860_v31 = vpack.c.bf16 %v3499_v27, %v3498_v25  ;;  %v3537_v25 = vld [vmem:[%s6754_s5 + $0x70] sm:$0xff]  ;;  %v3538_v27 = vld [vmem:[%s6754_s5 + $0x78] sm:$0xff] }
  0x5a   : > { %4844 = vmatprep.subr.bf16.mxu1 %v5035_v11  ;;  %4822 = vmatpush3.bf16.msra.mxu0 %v4821_v36  ;;  %v3517_v36 = vld [vmem:[%s6752_s3 + $0x1a8] sm:$0xff]  ;;  %v4932_v28 = vpack.c.bf16 %v3538_v27, %v3537_v25 }
  0x5b   : > { %4823 = vmatprep.subr.bf16.mxu0 %v5035_v11  ;;  %v4887_v38 = vpack.c.bf16 %v3517_v36, %v3516_v35  ;;  %v3479_v35 = vld [vmem:[%s6753_s4] ss:$0 sm:$0xff] }
  0x5d   : > { %4846 = vmatpush3.bf16.msra.mxu1 %v4845_v37  ;;  %v4863_v37 = vpack.c.bf16 %v3501_v34, %v3500_v33  ;;  %v3552_v33 = vld [vmem:[%s6754_s5 + $0xc8] sm:$0xff] }
  0x5e   : > { %4847 = vmatprep.subr.bf16.mxu1 %v5035_v11  ;;  %4825 = vmatpush3.bf16.msra.mxu0 %v4824_v41  ;;  %v3518_v41 = vld [vmem:[%s6752_s3 + $0x1b0] sm:$0xff] }
  0x5f   : > { %4826 = vmatprep.subr.bf16.mxu0 %v5035_v11  ;;  %v4890_v44 = vpack.c.bf16 %v3519_v42, %v3518_v41 }
  0x61   : > { %4849 = vmatpush3.bf16.msra.mxu1 %v4848_v43  ;;  %v4866_v43 = vpack.c.bf16 %v3503_v40, %v3502_v39 }
  0x62   : > { %4850 = vmatprep.subr.bf16.mxu1 %v5035_v11  ;;  %4828 = vmatpush3.bf16.msra.mxu0 %v4827_v47  ;;  %v3520_v47 = vld [vmem:[%s6752_s3 + $0x1c0] sm:$0xff] }
  0x63   : > { %4829 = vmatprep.subr.bf16.mxu0 %v5035_v11  ;;  %v4893_v51 = vpack.c.bf16 %v3521_v48, %v3520_v47 }
  0x65   : > { %4852 = vmatpush3.bf16.msra.mxu1 %v4851_v49  ;;  %v4869_v49 = vpack.c.bf16 %v3505_v46, %v3504_v45 }
  0x66   : > { %4853 = vmatprep.subr.bf16.mxu1 %v5035_v11  ;;  %4831 = vmatpush3.bf16.msra.mxu0 %v4830_v54  ;;  %v3522_v54 = vld [vmem:[%s6752_s3 + $0x1d0] sm:$0xff] }
  0x67   : > { %4856 = vmatprep.subr.bf16.mxu0 %v5035_v11 }
  0x69   : > { %4855 = vmatpush3.bf16.msra.mxu1 %v4854_v56  ;;  %v4872_v56 = vpack.c.bf16 %v3507_v53, %v3506_v52  ;;  %v3543_v52 = vld [vmem:[%s6754_s5 + $0x90] sm:$0xff] }
  0x6a   : > { %4880 = vmatprep.subr.bf16.mxu1 %v5035_v11 }
  0xfc   : > { %v3776_v58 = vpop.f32.mrb[0].mxu0 }
  0xfd   : > { %v3811_v59 = vpop.f32.mrb[0].mxu1  ;;  %v3777_v60 = vpop.f32.mrb[1].mxu0 }
  0xfe   : > { %v3778_v62 = vadd.f32 %v3777_v60, %v3776_v58  ;;  %v3812_v63 = vpop.f32.mrb[1].mxu1  ;;  %v3508_v58 = vld [vmem:[%s6752_s3 + $0x160] sm:$0xff] }
  0xff   : > { %v3813_v0 = vadd.f32 %v3812_v63, %v3811_v59  ;;  %v3509_v59 = vld [vmem:[%s6752_s3 + $0x168] sm:$0xff]  ;;  %v3524_v60 = vld [vmem:[%s6752_s3 + $0x1e0] sm:$0xff] }
 0x100   : > { %v496_v1 = vadd.f32 %v3778_v62, %v385_v61  ;;  %v4875_v62 = vpack.c.bf16 %v3509_v59, %v3508_v58  ;;  %v3545_v59 = vld [vmem:[%s6754_s5 + $0xa0] sm:$0xff] }
 0x101   : > { %v600_v2 = vadd.f32 %v3813_v0, %v385_v61  ;;  %v3510_v0 = vld [vmem:[%s6752_s3 + $0x170] sm:$0xff] }
 0x102   : > { %v499_v4 = vmax.f32 %v496_v1, 0.0  ;;  %v3511_v1 = vld [vmem:[%s6752_s3 + $0x178] sm:$0xff] }
 0x103   : > { %v603_v3 = vmax.f32 %v600_v2, 0.0  ;;  %v3526_v2 = vld [vmem:[%s6752_s3 + $0x1f0] sm:$0xff] }
 0x105   : > { %v839_v5 = vrot.slane %v603_v3, 7  ;;  %v3527_v3 = vld [vmem:[%s6752_s3 + $0x1f8] sm:$0xff] }
 0x107   : > { %v841_v6 = vsel %vm840_vm1, %v839_v5, %v499_v4  ;;  %v4878_v4 = vpack.c.bf16 %v3511_v1, %v3510_v0  ;;  %v4902_v5 = vpack.c.bf16 %v3527_v3, %v3526_v2  ;;  %v3556_v0 = vld [vmem:[%s6754_s5 + $0xe8] sm:$0xff]  ;;  %v3547_v3 = vld [vmem:[%s6754_s5 + $0xb0] sm:$0xff] }
 0x11c   : > { %v3846_v7 = vpop.f32.mrb[2].mxu0 }
 0x11d   : > { %v3881_v8 = vpop.f32.mrb[2].mxu1  ;;  %v3847_v9 = vpop.f32.mrb[3].mxu0 }
 0x11e   : > { %v3848_v10 = vadd.f32 %v3847_v9, %v3846_v7  ;;  %v3882_v12 = vpop.f32.mrb[3].mxu1  ;;  %v1186_v7 = vld [vmem:[%s6754_s5 + $0x8] sm:$0xff] }
 0x11f   : > { %v3883_v50 = vadd.f32 %v3882_v12, %v3881_v8  ;;  %v3531_v8 = vld [vmem:[%s6754_s5 + $0x40] sm:$0xff]  ;;  %v1188_v12 = vld [vmem:[%s6754_s5 + $0x18] sm:$0xff] }
 0x120   : > { %v704_v13 = vadd.f32 %v3848_v10, %v385_v61  ;;  %v1187_v10 = vld [vmem:[%s6754_s5 + $0x10] sm:$0xff] }
 0x121   : > { %v808_v14 = vadd.f32 %v3883_v50, %v385_v61  ;;  %v3525_v61 = vld [vmem:[%s6752_s3 + $0x1e8] sm:$0xff] }
 0x122   : > { %v707_v16 = vmax.f32 %v704_v13, 0.0  ;;  %v4899_v63 = vpack.c.bf16 %v3525_v61, %v3524_v60  ;;  %v4908_v13 = vpack.c.bf16 %v1188_v12, %v1187_v10  ;;  %v3570_v10 = vld [vmem:[%s6756_s7 + $0x20] sm:$0xff]  ;;  %v3571_v12 = vld [vmem:[%s6756_s7 + $0x28] sm:$0xff] }
 0x123   : > { %v811_v20 = vmax.f32 %v808_v14, 0.0  ;;  %v3533_v14 = vld [vmem:[%s6754_s5 + $0x50] sm:$0xff] }
 0x124   : > { %v842_v21 = vrot.slane %v707_v16, 6  ;;  %v1189_v16 = vld [vmem:[%s6754_s5 + $0x20] sm:$0xff]  ;;  %v4924_v17 = vpack.c.bf16 %v3534_v15, %v3533_v14  ;;  %v1548_v14 = vld [vmem:[%s6756_s7 + $0x10] sm:$0xff]  ;;  %v1549_v15 = vld [vmem:[%s6756_s7 + $0x18] sm:$0xff] }
 0x125   : > { %v845_v22 = vrot.slane %v811_v20, 5  ;;  %v3536_v20 = vld [vmem:[%s6754_s5 + $0x68] sm:$0xff] }
 0x126   : > { %v844_v26 = vsel %vm843_vm2, %v842_v21, %v841_v6  ;;  %v1185_v6 = vld [vmem:[%s6754_s5] sm:$0xff]  ;;  %v4912_v21 = vpack.c.bf16 %v1190_v18, %v1189_v16  ;;  %v3572_v16 = vld [vmem:[%s6756_s7 + $0x30] sm:$0xff]  ;;  %v3573_v18 = vld [vmem:[%s6756_s7 + $0x38] sm:$0xff] }
 0x127   : > { %v5665_v30 = vsel %vm846_vm3, %v845_v22, %v844_v26  ;;  %v4904_v9 = vpack.c.bf16 %v1186_v7, %v1185_v6  ;;  %v4928_v22 = vpack.c.bf16 %v3536_v20, %v3535_v19  ;;  %v3558_v6 = vld [vmem:[%s6754_s5 + $0xf8] sm:$0xff]  ;;  %v4980_v19 = vpack.c.bf16 %v3573_v18, %v3572_v16  ;;  %v3582_v20 = vld [vmem:[%s6756_s7 + $0x40] sm:$0xff] }
 0x128   : > { %4209 = vmatmul.mubr.f32.vlgmr.msra.gmra.mrb[4].mxu0 %v5665_v30  ;;  %4244 = vmatmul.mubr.f32.vlgmr.msra.gmra.mrb[4].mxu1 %v5665_v30 }
 0x129   : > { %4858 = vmatpush3.bf16.msra.mxu0 %v4857_v23  ;;  %4882 = vmatpush3.bf16.msra.mxu1 %v4881_v24  ;;  %v1191_v23 = vld [vmem:[%s6754_s5 + $0x30] sm:$0xff]  ;;  %v1192_v24 = vld [vmem:[%s6754_s5 + $0x38] sm:$0xff] }
 0x12a   : > { %4859 = vmatprep.subr.bf16.mxu0 %v5035_v11  ;;  %4883 = vmatprep.subr.bf16.mxu1 %v5035_v11  ;;  %v4916_v26 = vpack.c.bf16 %v1192_v24, %v1191_v23  ;;  %v3595_v24 = vld [vmem:[%s6756_s7 + $0x68] sm:$0xff] }
 0x12b   : > { %4278 = vmatprep.mubr.msk.f32.mxu0 %vm5036_vm0, %v5037_v57  ;;  %4313 = vmatprep.mubr.msk.f32.mxu1 %vm5036_vm0, %v5037_v57  ;;  %v4896_v57 = vpack.c.bf16 %v3523_v55, %v3522_v54  ;;  %v3544_v55 = vld [vmem:[%s6754_s5 + $0x98] sm:$0xff] }
 0x12c   : > { %v4940_v60 = vpack.c.bf16 %v3544_v55, %v3543_v52 }
 0x12d   : > { %4861 = vmatpush3.bf16.msra.mxu0 %v4860_v31  ;;  %4885 = vmatpush3.bf16.msra.mxu1 %v4884_v32  ;;  %v3551_v31 = vld [vmem:[%s6754_s5 + $0xc0] sm:$0xff] }
 0x12e   : > { %4862 = vmatprep.subr.bf16.mxu0 %v5035_v11  ;;  %4886 = vmatprep.subr.bf16.mxu1 %v5035_v11  ;;  %v4952_v34 = vpack.c.bf16 %v3552_v33, %v3551_v31 }
 0x131   : > { %4864 = vmatpush3.bf16.msra.mxu0 %v4863_v37  ;;  %4888 = vmatpush3.bf16.msra.mxu1 %v4887_v38 }
 0x132   : > { %4865 = vmatprep.subr.bf16.mxu0 %v5035_v11  ;;  %4889 = vmatprep.subr.bf16.mxu1 %v5035_v11 }
 0x135   : > { %4867 = vmatpush3.bf16.msra.mxu0 %v4866_v43  ;;  %4891 = vmatpush3.bf16.msra.mxu1 %v4890_v44 }
 0x136   : > { %4868 = vmatprep.subr.bf16.mxu0 %v5035_v11  ;;  %4892 = vmatprep.subr.bf16.mxu1 %v5035_v11 }
 0x139   : > { %4870 = vmatpush3.bf16.msra.mxu0 %v4869_v49  ;;  %4894 = vmatpush3.bf16.msra.mxu1 %v4893_v51 }
 0x13a   : > { %4871 = vmatprep.subr.bf16.mxu0 %v5035_v11  ;;  %4895 = vmatprep.subr.bf16.mxu1 %v5035_v11 }
 0x13d   : > { %4873 = vmatpush3.bf16.msra.mxu0 %v4872_v56  ;;  %4897 = vmatpush3.bf16.msra.mxu1 %v4896_v57  ;;  %v3553_v56 = vld [vmem:[%s6754_s5 + $0xd0] sm:$0xff]  ;;  %v3554_v57 = vld [vmem:[%s6754_s5 + $0xd8] sm:$0xff] }
 0x13e   : > { %4874 = vmatprep.subr.bf16.mxu0 %v5035_v11  ;;  %4898 = vmatprep.subr.bf16.mxu1 %v5035_v11  ;;  %v4956_v61 = vpack.c.bf16 %v3554_v57, %v3553_v56 }
 0x141   : > { %4876 = vmatpush3.bf16.msra.mxu0 %v4875_v62  ;;  %4900 = vmatpush3.bf16.msra.mxu1 %v4899_v63  ;;  %v3546_v62 = vld [vmem:[%s6754_s5 + $0xa8] sm:$0xff]  ;;  %v3555_v63 = vld [vmem:[%s6754_s5 + $0xe0] sm:$0xff] }
 0x142   : > { %4877 = vmatprep.subr.bf16.mxu0 %v5035_v11  ;;  %4901 = vmatprep.subr.bf16.mxu1 %v5035_v11  ;;  %v3532_v11 = vld [vmem:[%s6754_s5 + $0x48] sm:$0xff]  ;;  %v4944_v1 = vpack.c.bf16 %v3546_v62, %v3545_v59  ;;  %v4960_v2 = vpack.c.bf16 %v3556_v0, %v3555_v63  ;;  %v3673_v0 = vld [vmem:[%s6758_s9 + $0x20] sm:$0xff] }
 0x143   : > { %v4920_v50 = vpack.c.bf16 %v3532_v11, %v3531_v8  ;;  %v1547_v11 = vld [vmem:[%s6756_s7 + $0x8] sm:$0xff] }
 0x145   : > { %4879 = vmatpush3.bf16.msra.mxu0 %v4878_v4  ;;  %4903 = vmatpush3.bf16.msra.mxu1 %v4902_v5  ;;  %v3548_v4 = vld [vmem:[%s6754_s5 + $0xb8] sm:$0xff]  ;;  %v3557_v5 = vld [vmem:[%s6754_s5 + $0xf0] sm:$0xff] }
 0x146   : > { %4905 = vmatprep.subr.bf16.mxu0 %v4904_v9  ;;  %4921 = vmatprep.subr.bf16.mxu1 %v4920_v50  ;;  %v4948_v7 = vpack.c.bf16 %v3548_v4, %v3547_v3  ;;  %v4964_v8 = vpack.c.bf16 %v3558_v6, %v3557_v5  ;;  %v3708_v4 = vld [vmem:[%s6758_s9 + $0x38] sm:$0xff]  ;;  %v5976_v6 = vld [vmem:[%s6757_s8] ss:$0 sm:$0xff] }
 0x148   : > { %4279 = vmatmul.mubr.f32.vlgmr.msra.gmra.mrb[6].mxu0 %v5665_v30  ;;  %4314 = vmatmul.mubr.f32.vlgmr.msra.gmra.mrb[6].mxu1 %v5665_v30  ;;  %v3542_v30 = vld [vmem:[%s6754_s5 + $0x88] sm:$0xff] }
 0x149   : > { %4907 = vmatpush3.bf16.msra.mxu0 %v4904_v9  ;;  %4923 = vmatpush3.bf16.msra.mxu1 %v4920_v50  ;;  %v4936_v32 = vpack.c.bf16 %v3542_v30, %v3541_v29  ;;  %v1546_v9 = vld [vmem:[%s6756_s7] sm:$0xff] }
 0x14a   : > { %4909 = vmatprep.subr.bf16.mxu0 %v4908_v13  ;;  %4925 = vmatprep.subr.bf16.mxu1 %v4924_v17  ;;  %v4968_v50 = vpack.c.bf16 %v1547_v11, %v1546_v9 }
 0x14d   : > { %4911 = vmatpush3.bf16.msra.mxu0 %v4908_v13  ;;  %4927 = vmatpush3.bf16.msra.mxu1 %v4924_v17  ;;  %v4976_v13 = vpack.c.bf16 %v3571_v12, %v3570_v10  ;;  %v4972_v17 = vpack.c.bf16 %v1549_v15, %v1548_v14 }
 0x14e   : > { %4913 = vmatprep.subr.bf16.mxu0 %v4912_v21  ;;  %4929 = vmatprep.subr.bf16.mxu1 %v4928_v22 }
 0x151   : > { %4915 = vmatpush3.bf16.msra.mxu0 %v4912_v21  ;;  %4931 = vmatpush3.bf16.msra.mxu1 %v4928_v22  ;;  %v3583_v21 = vld [vmem:[%s6756_s7 + $0x48] sm:$0xff]  ;;  %v3594_v22 = vld [vmem:[%s6756_s7 + $0x60] sm:$0xff] }
 0x152   : > { %4917 = vmatprep.subr.bf16.mxu0 %v4916_v26  ;;  %4933 = vmatprep.subr.bf16.mxu1 %v4932_v28  ;;  %v4984_v23 = vpack.c.bf16 %v3583_v21, %v3582_v20  ;;  %v4992_v25 = vpack.c.bf16 %v3595_v24, %v3594_v22 }
 0x155   : > { %4919 = vmatpush3.bf16.msra.mxu0 %v4916_v26  ;;  %4935 = vmatpush3.bf16.msra.mxu1 %v4932_v28  ;;  %v3528_v26 = vld [vmem:[%s6755_s6] ss:$0 sm:$0xff] }
 0x156   : > { %4937 = vmatprep.subr.bf16.mxu0 %v4936_v32  ;;  %4953 = vmatprep.subr.bf16.mxu1 %v4952_v34 }
 0x1fb   : > { %v915_v36 = vpop.f32.mrb[4].mxu0  ;;  %v1003_v37 = vpop.f32.mrb[4].mxu1 }
 0x1fc   : > { %v916_v38 = vadd.f32 %v3479_v35, %v915_v36  ;;  %v1004_v39 = vadd.f32 %v3479_v35, %v1003_v37  ;;  %v4210_v40 = vpop.f32.mrb[5].mxu0  ;;  %v4245_v41 = vpop.f32.mrb[5].mxu1  ;;  %v3596_v36 = vld [vmem:[%s6756_s7 + $0x70] sm:$0xff]  ;;  %v3597_v37 = vld [vmem:[%s6756_s7 + $0x78] sm:$0xff] }
 0x1fe   : > { %v919_v42 = vmax.f32 %v916_v38, 0.0  ;;  %v1007_v43 = vmax.f32 %v1004_v39, 0.0 }
 0x200   : > { %v1203_v44 = vcombine.low %v919_v42, %v1007_v43  ;;  %v4996_v43 = vpack.c.bf16 %v3597_v37, %v3596_v36 }
 0x202   : > { %4332 = vmatprep.mubr.msk.f32.mxu0 %vm1205_vm4, %v1203_v44  ;;  %4351 = vmatprep.mubr.msk.f32.mxu1 %vm1205_vm4, %v1203_v44 }
 0x21b   : > { %v1091_v45 = vpop.f32.mrb[6].mxu0  ;;  %v1179_v46 = vpop.f32.mrb[6].mxu1 }
 0x21c   : > { %v1092_v47 = vadd.f32 %v3479_v35, %v1091_v45  ;;  %v1180_v48 = vadd.f32 %v3479_v35, %v1179_v46  ;;  %v4280_v49 = vpop.f32.mrb[7].mxu0  ;;  %v4315_v51 = vpop.f32.mrb[7].mxu1  ;;  %v3585_v35 = vld [vmem:[%s6756_s7 + $0x58] sm:$0xff]  ;;  %v2050_v45 = vld [vmem:[%s6758_s9 + $0x8] sm:$0xff]  ;;  %v3639_v46 = vld [vmem:[%s6758_s9 + $0x10] sm:$0xff] }
 0x21e   : > { %v1095_v53 = vmax.f32 %v1092_v47, 0.0  ;;  %v1183_v54 = vmax.f32 %v1180_v48, 0.0  ;;  %v3640_v47 = vld [vmem:[%s6758_s9 + $0x18] sm:$0xff] }
 0x21f   : > { %v5004_v51 = vpack.c.bf16 %v3640_v47, %v3639_v46 }
 0x220   : > { %v1204_v58 = vcombine.low %v1095_v53, %v1183_v54 }
 0x222   : > { %4333 = vmatmul.mubr.msk.f32.vlgmr.msra.gmra.mrb[8].mxu0 %vm1205_vm4, %v1204_v58  ;;  %4352 = vmatmul.mubr.msk.f32.vlgmr.msra.gmra.mrb[8].mxu1 %vm1205_vm4, %v1204_v58 }
 0x223   : > { %4939 = vmatpush3.bf16.msra.mxu0 %v4936_v32  ;;  %4955 = vmatpush3.bf16.msra.mxu1 %v4952_v34  ;;  %v3584_v34 = vld [vmem:[%s6756_s7 + $0x50] sm:$0xff] }
 0x224   : > { %4370 = vmatprep.mubr.msk.f32.mxu0 %vm1205_vm4, %v1203_v44  ;;  %4389 = vmatprep.mubr.msk.f32.mxu1 %vm1205_vm4, %v1203_v44  ;;  %v4988_v42 = vpack.c.bf16 %v3585_v35, %v3584_v34  ;;  %v2049_v44 = vld [vmem:[%s6758_s9] sm:$0xff] }
 0x225   : > { %4941 = vmatprep.subr.bf16.mxu0 %v4940_v60  ;;  %4957 = vmatprep.subr.bf16.mxu1 %v4956_v61  ;;  %v5000_v49 = vpack.c.bf16 %v2050_v45, %v2049_v44 }
 0x227   : > { %4943 = vmatpush3.bf16.msra.mxu0 %v4940_v60  ;;  %4959 = vmatpush3.bf16.msra.mxu1 %v4956_v61 }
 0x228   : > { %4945 = vmatprep.subr.bf16.mxu0 %v4944_v1  ;;  %4961 = vmatprep.subr.bf16.mxu1 %v4960_v2 }
 0x22b   : > { %4947 = vmatpush3.bf16.msra.mxu0 %v4944_v1  ;;  %4963 = vmatpush3.bf16.msra.mxu1 %v4960_v2  ;;  %v3674_v1 = vld [vmem:[%s6758_s9 + $0x28] sm:$0xff]  ;;  %v3707_v2 = vld [vmem:[%s6758_s9 + $0x30] sm:$0xff] }
 0x22c   : > { %4949 = vmatprep.subr.bf16.mxu0 %v4948_v7  ;;  %4965 = vmatprep.subr.bf16.mxu1 %v4964_v8  ;;  %v5008_v3 = vpack.c.bf16 %v3674_v1, %v3673_v0  ;;  %v5012_v5 = vpack.c.bf16 %v3708_v4, %v3707_v2 }
 0x22f   : > { %4951 = vmatpush3.bf16.msra.mxu0 %v4948_v7  ;;  %4967 = vmatpush3.bf16.msra.mxu1 %v4964_v8 }
 0x230   : > { %4969 = vmatprep.subr.bf16.mxu0 %v4968_v50  ;;  %4977 = vmatprep.subr.bf16.mxu1 %v4976_v13 }
 0x232   : > { %4371 = vmatmul.mubr.msk.f32.vlgmr.msra.gmra.mrb[10].mxu0 %vm1205_vm4, %v1204_v58  ;;  %4390 = vmatmul.mubr.msk.f32.vlgmr.msra.gmra.mrb[10].mxu1 %vm1205_vm4, %v1204_v58 }
 0x233   : > { %4971 = vmatpush3.bf16.msra.mxu0 %v4968_v50  ;;  %4979 = vmatpush3.bf16.msra.mxu1 %v4976_v13 }
 0x234   : > { %4973 = vmatprep.subr.bf16.mxu0 %v4972_v17  ;;  %4981 = vmatprep.subr.bf16.mxu1 %v4980_v19 }
 0x237   : > { %4975 = vmatpush3.bf16.msra.mxu0 %v4972_v17  ;;  %4983 = vmatpush3.bf16.msra.mxu1 %v4980_v19 }
 0x238   : > { %4985 = vmatprep.subr.bf16.mxu0 %v4984_v23  ;;  %4993 = vmatprep.subr.bf16.mxu1 %v4992_v25 }
 0x2f5   : > { %v4334_v27 = vpop.f32.mrb[8].mxu0  ;;  %v4353_v28 = vpop.f32.mrb[8].mxu1 }
 0x2f6   : > { %v1282_v29 = vadd.f32 %v4334_v27, %v3528_v26  ;;  %v1276_v30 = vpop.f32.mrb[9].mxu0  ;;  %v1362_v31 = vpop.f32.mrb[9].mxu1  ;;  %v1368_v40 = vadd.f32 %v4353_v28, %v3528_v26 }
 0x2f7   : > { %v1277_v32 = vadd.f32 %v3528_v26, %v1276_v30  ;;  %v1363_v33 = vadd.f32 %v3528_v26, %v1362_v31 }
 0x2f8   : > { %v1286_v39 = vmax.f32 %v1282_v29, 0.0  ;;  %v1372_v48 = vmax.f32 %v1368_v40, 0.0 }
 0x2f9   : > { %v1285_v38 = vmax.f32 %v1277_v32, 0.0  ;;  %v1371_v41 = vmax.f32 %v1363_v33, 0.0 }
 0x2fb   : > { %4400 = vmatprep.mubr.msk.f32.mxu0 %vm1556_vm5, %v1285_v38  ;;  %4420 = vmatprep.mubr.msk.f32.mxu1 %vm1556_vm5, %v1285_v38 }
 0x2fc   : > { %4401 = vmatmul.mubr.msk.f32.vlgmr.msra.gmra.mrb[12].mxu0 %vm1556_vm5, %v1286_v39  ;;  %4421 = vmatmul.mubr.msk.f32.vlgmr.msra.gmra.mrb[12].mxu1 %vm1556_vm5, %v1286_v39 }
 0x2fd   : > { %4403 = vmatprep.mubr.msk.f32.mxu0 %vm1556_vm5, %v1371_v41  ;;  %4423 = vmatprep.mubr.msk.f32.mxu1 %vm1556_vm5, %v1371_v41 }
 0x2fe   : > { %4987 = vmatpush3.bf16.msra.mxu0 %v4984_v23  ;;  %4995 = vmatpush3.bf16.msra.mxu1 %v4992_v25 }
 0x2ff   : > { %4989 = vmatprep.subr.bf16.mxu0 %v4988_v42  ;;  %4997 = vmatprep.subr.bf16.mxu1 %v4996_v43 }
 0x300   : > { %4404 = vmatmul.mubr.msk.f32.gmra.mrb[14].mxu0 %vm1556_vm5, %v1372_v48  ;;  %4424 = vmatmul.mubr.msk.f32.gmra.mrb[14].mxu1 %vm1556_vm5, %v1372_v48 }
 0x302   : > { %4991 = vmatpush3.bf16.msra.mxu0 %v4988_v42  ;;  %4999 = vmatpush3.bf16.msra.mxu1 %v4996_v43 }
 0x303   : > { %5001 = vmatprep.subr.bf16.mxu0 %v5000_v49  ;;  %5005 = vmatprep.subr.bf16.mxu1 %v5004_v51 }
 0x305   : > { %v4372_v52 = vpop.f32.mrb[10].mxu0  ;;  %v4391_v53 = vpop.f32.mrb[10].mxu1 }
 0x306   : > { %v1454_v54 = vadd.f32 %v4372_v52, %v3528_v26  ;;  %v1448_v55 = vpop.f32.mrb[11].mxu0  ;;  %v1534_v56 = vpop.f32.mrb[11].mxu1  ;;  %v1540_v61 = vadd.f32 %v4391_v53, %v3528_v26 }
 0x307   : > { %v1449_v57 = vadd.f32 %v3528_v26, %v1448_v55  ;;  %v1535_v58 = vadd.f32 %v3528_v26, %v1534_v56 }
 0x308   : > { %v1458_v60 = vmax.f32 %v1454_v54, 0.0  ;;  %v1544_v63 = vmax.f32 %v1540_v61, 0.0 }
 0x309   : > { %v1457_v59 = vmax.f32 %v1449_v57, 0.0  ;;  %v1543_v62 = vmax.f32 %v1535_v58, 0.0 }
 0x30b   : > { %4406 = vmatprep.mubr.msk.f32.mxu0 %vm1556_vm5, %v1457_v59  ;;  %4426 = vmatprep.mubr.msk.f32.mxu1 %vm1556_vm5, %v1457_v59 }
 0x30c   : > { %4407 = vmatmul.mubr.msk.f32.gmra.mrb[16].mxu0 %vm1556_vm5, %v1458_v60  ;;  %4427 = vmatmul.mubr.msk.f32.gmra.mrb[16].mxu1 %vm1556_vm5, %v1458_v60 }
 0x30d   : > { %4409 = vmatprep.mubr.msk.f32.mxu0 %vm1556_vm5, %v1543_v62  ;;  %4429 = vmatprep.mubr.msk.f32.mxu1 %vm1556_vm5, %v1543_v62 }
 0x310   : > { %4410 = vmatmul.mubr.msk.f32.gmra.mrb[18].mxu0 %vm1556_vm5, %v1544_v63  ;;  %4430 = vmatmul.mubr.msk.f32.gmra.mrb[18].mxu1 %vm1556_vm5, %v1544_v63 }
 0x311   : > { %4440 = vmatprep.mubr.msk.f32.mxu0 %vm1556_vm5, %v1285_v38  ;;  %4460 = vmatprep.mubr.msk.f32.mxu1 %vm1556_vm5, %v1285_v38 }
 0x314   : > { %4441 = vmatmul.mubr.msk.f32.vlgmr.msra.gmra.mrb[20].mxu0 %vm1556_vm5, %v1286_v39  ;;  %4461 = vmatmul.mubr.msk.f32.vlgmr.msra.gmra.mrb[20].mxu1 %vm1556_vm5, %v1286_v39 }
 0x315   : > { %4443 = vmatprep.mubr.msk.f32.mxu0 %vm1556_vm5, %v1371_v41  ;;  %4463 = vmatprep.mubr.msk.f32.mxu1 %vm1556_vm5, %v1371_v41 }
 0x316   : > { %5003 = vmatpush3.bf16.msra.mxu0 %v5000_v49  ;;  %5007 = vmatpush3.bf16.msra.mxu1 %v5004_v51 }
 0x317   : > { %5009 = vmatprep.subr.bf16.mxu0 %v5008_v3  ;;  %5013 = vmatprep.subr.bf16.mxu1 %v5012_v5 }
 0x318   : > { %4444 = vmatmul.mubr.msk.f32.gmra.mrb[22].mxu0 %vm1556_vm5, %v1372_v48  ;;  %4464 = vmatmul.mubr.msk.f32.gmra.mrb[22].mxu1 %vm1556_vm5, %v1372_v48 }
 0x319   : > { %4446 = vmatprep.mubr.msk.f32.mxu0 %vm1556_vm5, %v1457_v59  ;;  %4466 = vmatprep.mubr.msk.f32.mxu1 %vm1556_vm5, %v1457_v59 }
 0x31c   : > { %4447 = vmatmul.mubr.msk.f32.gmra.mrb[24].mxu0 %vm1556_vm5, %v1458_v60  ;;  %4467 = vmatmul.mubr.msk.f32.gmra.mrb[24].mxu1 %vm1556_vm5, %v1458_v60 }
 0x31d   : > { %4449 = vmatprep.mubr.msk.f32.mxu0 %vm1556_vm5, %v1543_v62  ;;  %4469 = vmatprep.mubr.msk.f32.mxu1 %vm1556_vm5, %v1543_v62 }
 0x320   : > { %4450 = vmatmul.mubr.msk.f32.gmra.mrb[26].mxu0 %vm1556_vm5, %v1544_v63  ;;  %4470 = vmatmul.mubr.msk.f32.gmra.mrb[26].mxu1 %vm1556_vm5, %v1544_v63 }
 0x3cf   : > { %v4402_v7 = vpop.f32.mrb[12].mxu0  ;;  %v4422_v8 = vpop.f32.mrb[12].mxu1 }
 0x3d0   : > { %v1653_v9 = vadd.f32 %v4402_v7, %v5976_v6  ;;  %v1647_v11 = vpop.f32.mrb[13].mxu0  ;;  %v1765_v10 = vpop.f32.mrb[13].mxu1  ;;  %v1771_v40 = vadd.f32 %v4422_v8, %v5976_v6 }
 0x3d1   : > { %v1648_v12 = vadd.f32 %v5976_v6, %v1647_v11  ;;  %v1766_v35 = vadd.f32 %v5976_v6, %v1765_v10 }
 0x3d2   : > { %v5982_v15 = vmax.f32 %v1653_v9, 0.0  ;;  %v6049_v48 = vmax.f32 %v1771_v40, 0.0 }
 0x3d3   : > { %v5980_v50 = vmax.f32 %v1648_v12, 0.0  ;;  %v4405_v13 = vpop.f32.mrb[14].mxu0  ;;  %v4425_v14 = vpop.f32.mrb[14].mxu1  ;;  %v6032_v44 = vmax.f32 %v1766_v35, 0.0 }
 0x3d4   : > { %v1663_v16 = vadd.f32 %v4405_v13, %v5976_v6  ;;  %v1657_v17 = vpop.f32.mrb[15].mxu0  ;;  %v1775_v18 = vpop.f32.mrb[15].mxu1  ;;  %v1781_v49 = vadd.f32 %v4425_v14, %v5976_v6 }
 0x3d5   : > { %v1658_v19 = vadd.f32 %v5976_v6, %v1657_v17  ;;  %4476 = vmatprep.mubr.msk.f32.mxu0 %vm2057_vm6, %v5980_v50  ;;  %4528 = vmatprep.mubr.msk.f32.mxu1 %vm2057_vm6, %v5980_v50  ;;  %v1776_v45 = vadd.f32 %v5976_v6, %v1775_v18 }
 0x3d6   : > { %4477 = vmatmul.mubr.msk.f32.vlgmr.msra.gmra.mrb[28].mxu0 %vm2057_vm6, %v5982_v15  ;;  %4529 = vmatmul.mubr.msk.f32.vlgmr.msra.gmra.mrb[28].mxu1 %vm2057_vm6, %v5982_v15  ;;  %v5996_v21 = vmax.f32 %v1663_v16, 0.0  ;;  %v6065_v57 = vmax.f32 %v1781_v49, 0.0 }
 0x3d7   : > { %v5994_v20 = vmax.f32 %v1658_v19, 0.0  ;;  %5011 = vmatpush3.bf16.msra.mxu0 %v5008_v3  ;;  %5015 = vmatpush3.bf16.msra.mxu1 %v5012_v5  ;;  %v6054_v53 = vmax.f32 %v1776_v45, 0.0 }
 0x3d9   : > { %4479 = vmatprep.mubr.msk.f32.mxu0 %vm2057_vm6, %v5994_v20  ;;  %4531 = vmatprep.mubr.msk.f32.mxu1 %vm2057_vm6, %v5994_v20 }
 0x3da   : > { %4480 = vmatmul.mubr.msk.f32.gmra.mrb[30].mxu0 %vm2057_vm6, %v5996_v21  ;;  %4532 = vmatmul.mubr.msk.f32.gmra.mrb[30].mxu1 %vm2057_vm6, %v5996_v21 }
 0x3df   : > { %v4408_v22 = vpop.f32.mrb[16].mxu0  ;;  %v4428_v23 = vpop.f32.mrb[16].mxu1 }
 0x3e0   : > { %v1673_v24 = vadd.f32 %v4408_v22, %v5976_v6  ;;  %v1667_v25 = vpop.f32.mrb[17].mxu0  ;;  %v1785_v26 = vpop.f32.mrb[17].mxu1  ;;  %v1791_v58 = vadd.f32 %v4428_v23, %v5976_v6 }
 0x3e1   : > { %v1668_v27 = vadd.f32 %v5976_v6, %v1667_v25  ;;  %v1786_v54 = vadd.f32 %v5976_v6, %v1785_v26 }
 0x3e2   : > { %v6010_v31 = vmax.f32 %v1673_v24, 0.0  ;;  %v6084_v2 = vmax.f32 %v1791_v58, 0.0 }
 0x3e3   : > { %v6008_v28 = vmax.f32 %v1668_v27, 0.0  ;;  %v4411_v29 = vpop.f32.mrb[18].mxu0  ;;  %v4431_v30 = vpop.f32.mrb[18].mxu1  ;;  %v6073_v62 = vmax.f32 %v1786_v54, 0.0 }
 0x3e4   : > { %v1683_v32 = vadd.f32 %v4411_v29, %v5976_v6  ;;  %v1677_v33 = vpop.f32.mrb[19].mxu0  ;;  %v1795_v34 = vpop.f32.mrb[19].mxu1  ;;  %v1801_v3 = vadd.f32 %v4431_v30, %v5976_v6 }
 0x3e5   : > { %v1678_v36 = vadd.f32 %v5976_v6, %v1677_v33  ;;  %4482 = vmatprep.mubr.msk.f32.mxu0 %vm2057_vm6, %v6008_v28  ;;  %4534 = vmatprep.mubr.msk.f32.mxu1 %vm2057_vm6, %v6008_v28  ;;  %v1796_v63 = vadd.f32 %v5976_v6, %v1795_v34 }
 0x3e6   : > { %4483 = vmatmul.mubr.msk.f32.gmra.mrb[32].mxu0 %vm2057_vm6, %v6010_v31  ;;  %4535 = vmatmul.mubr.msk.f32.gmra.mrb[32].mxu1 %vm2057_vm6, %v6010_v31  ;;  %v6028_v41 = vmax.f32 %v1683_v32, 0.0  ;;  %v6102_v10 = vmax.f32 %v1801_v3, 0.0 }
 0x3e7   : > { %v6023_v37 = vmax.f32 %v1678_v36, 0.0  ;;  %v4442_v38 = vpop.f32.mrb[20].mxu0  ;;  %v6025_v39 = vpop.f32.mrb[20].mxu1  ;;  %v6090_v8 = vmax.f32 %v1796_v63, 0.0 }
 0x3e8   : > { %v1883_v42 = vpop.f32.mrb[21].mxu0  ;;  %v6030_v43 = vpop.f32.mrb[21].mxu1  ;;  %v1889_v12 = vadd.f32 %v4442_v38, %v5976_v6  ;;  %v2007_v32 = vadd.f32 %v6025_v39, %v5976_v6 }
 0x3e9   : > { %4485 = vmatprep.mubr.msk.f32.mxu0 %vm2057_vm6, %v6023_v37  ;;  %4537 = vmatprep.mubr.msk.f32.mxu1 %vm2057_vm6, %v6023_v37  ;;  %v1884_v9 = vadd.f32 %v5976_v6, %v1883_v42  ;;  %v2002_v29 = vadd.f32 %v5976_v6, %v6030_v43 }
 0x3ea   : > { %4486 = vmatmul.mubr.msk.f32.gmra.mrb[34].mxu0 %vm2057_vm6, %v6028_v41  ;;  %4538 = vmatmul.mubr.msk.f32.gmra.mrb[34].mxu1 %vm2057_vm6, %v6028_v41  ;;  %v6116_v16 = vmax.f32 %v1889_v12, 0.0  ;;  %v6175_v36 = vmax.f32 %v2007_v32, 0.0 }
 0x3eb   : > { %v4445_v46 = vpop.f32.mrb[22].mxu0  ;;  %v6043_v47 = vpop.f32.mrb[22].mxu1  ;;  %4488 = vmatprep.mubr.msk.f32.mxu0 %vm2057_vm6, %v6032_v44  ;;  %4540 = vmatprep.mubr.msk.f32.mxu1 %vm2057_vm6, %v6032_v44  ;;  %v6105_v13 = vmax.f32 %v1884_v9, 0.0  ;;  %v6163_v34 = vmax.f32 %v2002_v29, 0.0 }
 0x3ec   : > { %v1893_v51 = vpop.f32.mrb[23].mxu0  ;;  %v6052_v52 = vpop.f32.mrb[23].mxu1  ;;  %v1899_v17 = vadd.f32 %v4445_v46, %v5976_v6  ;;  %v2017_v38 = vadd.f32 %v6043_v47, %v5976_v6 }
 0x3ed   : > { %v1894_v14 = vadd.f32 %v5976_v6, %v1893_v51  ;;  %v2012_v35 = vadd.f32 %v5976_v6, %v6052_v52 }
 0x3ee   : > { %4489 = vmatmul.mubr.msk.f32.gmra.mrb[36].mxu0 %vm2057_vm6, %v6049_v48  ;;  %4541 = vmatmul.mubr.msk.f32.gmra.mrb[36].mxu1 %vm2057_vm6, %v6049_v48  ;;  %v6130_v22 = vmax.f32 %v1899_v17, 0.0  ;;  %v6191_v42 = vmax.f32 %v2017_v38, 0.0 }
 0x3ef   : > { %v4448_v55 = vpop.f32.mrb[24].mxu0  ;;  %v4468_v56 = vpop.f32.mrb[24].mxu1  ;;  %4491 = vmatprep.mubr.msk.f32.mxu0 %vm2057_vm6, %v6054_v53  ;;  %4543 = vmatprep.mubr.msk.f32.mxu1 %vm2057_vm6, %v6054_v53  ;;  %v6119_v18 = vmax.f32 %v1894_v14, 0.0  ;;  %v6179_v39 = vmax.f32 %v2012_v35, 0.0 }
 0x3f0   : > { %v6069_v59 = vadd.f32 %v4468_v56, %v5976_v6  ;;  %v1903_v60 = vpop.f32.mrb[25].mxu0  ;;  %v6071_v61 = vpop.f32.mrb[25].mxu1  ;;  %v1909_v23 = vadd.f32 %v4448_v55, %v5976_v6 }
 0x3f1   : > { %v1904_v19 = vadd.f32 %v5976_v6, %v1903_v60  ;;  %v2022_v40 = vadd.f32 %v5976_v6, %v6071_v61 }
 0x3f2   : > { %4492 = vmatmul.mubr.msk.f32.gmra.mrb[38].mxu0 %vm2057_vm6, %v6065_v57  ;;  %4544 = vmatmul.mubr.msk.f32.gmra.mrb[38].mxu1 %vm2057_vm6, %v6065_v57  ;;  %v6144_v26 = vmax.f32 %v1909_v23, 0.0 }
 0x3f3   : > { %v4451_v0 = vpop.f32.mrb[26].mxu0  ;;  %v4471_v1 = vpop.f32.mrb[26].mxu1  ;;  %4494 = vmatprep.mubr.msk.f32.mxu0 %vm2057_vm6, %v6073_v62  ;;  %4546 = vmatprep.mubr.msk.f32.mxu1 %vm2057_vm6, %v6073_v62  ;;  %v6133_v24 = vmax.f32 %v1904_v19, 0.0  ;;  %v6193_v43 = vmax.f32 %v2022_v40, 0.0 }
 0x3f4   : > { %v6088_v4 = vadd.f32 %v4471_v1, %v5976_v6  ;;  %v1913_v5 = vpop.f32.mrb[27].mxu0  ;;  %v2031_v7 = vpop.f32.mrb[27].mxu1  ;;  %v1919_v27 = vadd.f32 %v4451_v0, %v5976_v6 }
 0x3f5   : > { %v2032_v11 = vadd.f32 %v5976_v6, %v2031_v7  ;;  %v1914_v25 = vadd.f32 %v5976_v6, %v1913_v5  ;;  %v6204_v6 = vmax.f32 %v6069_v59, 0.0 }
 0x3f6   : > { %4495 = vmatmul.mubr.msk.f32.gmra.mrb[40].mxu0 %vm2057_vm6, %v6084_v2  ;;  %4547 = vmatmul.mubr.msk.f32.gmra.mrb[40].mxu1 %vm2057_vm6, %v6084_v2  ;;  %v6161_v33 = vmax.f32 %v1919_v27, 0.0  ;;  %v6217_v46 = vmax.f32 %v6088_v4, 0.0 }
 0x3f7   : > { %4497 = vmatprep.mubr.msk.f32.mxu0 %vm2057_vm6, %v6090_v8  ;;  %4549 = vmatprep.mubr.msk.f32.mxu1 %vm2057_vm6, %v6090_v8  ;;  %v6149_v30 = vmax.f32 %v1914_v25, 0.0  ;;  %v6206_v45 = vmax.f32 %v2032_v11, 0.0 }
 0x3fa   : > { %4498 = vmatmul.mubr.msk.f32.gmra.mrb[42].mxu0 %vm2057_vm6, %v6102_v10  ;;  %4550 = vmatmul.mubr.msk.f32.gmra.mrb[42].mxu1 %vm2057_vm6, %v6102_v10 }
 0x3fb   : > { %4500 = vmatprep.mubr.msk.f32.mxu0 %vm2057_vm6, %v6105_v13  ;;  %4552 = vmatprep.mubr.msk.f32.mxu1 %vm2057_vm6, %v6105_v13 }
 0x3fe   : > { %4501 = vmatmul.mubr.msk.f32.gmra.mrb[44].mxu0 %vm2057_vm6, %v6116_v16  ;;  %4553 = vmatmul.mubr.msk.f32.gmra.mrb[44].mxu1 %vm2057_vm6, %v6116_v16 }
 0x3ff   : > { %4503 = vmatprep.mubr.msk.f32.mxu0 %vm2057_vm6, %v6119_v18  ;;  %4555 = vmatprep.mubr.msk.f32.mxu1 %vm2057_vm6, %v6119_v18 }
 0x402   : > { %4504 = vmatmul.mubr.msk.f32.gmra.mrb[46].mxu0 %vm2057_vm6, %v6130_v22  ;;  %4556 = vmatmul.mubr.msk.f32.gmra.mrb[46].mxu1 %vm2057_vm6, %v6130_v22 }
 0x403   : > { %4506 = vmatprep.mubr.msk.f32.mxu0 %vm2057_vm6, %v6133_v24  ;;  %4558 = vmatprep.mubr.msk.f32.mxu1 %vm2057_vm6, %v6133_v24 }
 0x406   : > { %4507 = vmatmul.mubr.msk.f32.gmra.mrb[48].mxu0 %vm2057_vm6, %v6144_v26  ;;  %4559 = vmatmul.mubr.msk.f32.gmra.mrb[48].mxu1 %vm2057_vm6, %v6144_v26 }
 0x407   : > { %4509 = vmatprep.mubr.msk.f32.mxu0 %vm2057_vm6, %v6149_v30  ;;  %4561 = vmatprep.mubr.msk.f32.mxu1 %vm2057_vm6, %v6149_v30 }
 0x40a   : > { %4510 = vmatmul.mubr.msk.f32.gmra.mrb[50].mxu0 %vm2057_vm6, %v6161_v33  ;;  %4562 = vmatmul.mubr.msk.f32.gmra.mrb[50].mxu1 %vm2057_vm6, %v6161_v33 }
 0x40b   : > { %4512 = vmatprep.mubr.msk.f32.mxu0 %vm2057_vm6, %v6163_v34  ;;  %4564 = vmatprep.mubr.msk.f32.mxu1 %vm2057_vm6, %v6163_v34 }
 0x40e   : > { %4513 = vmatmul.mubr.msk.f32.gmra.mrb[52].mxu0 %vm2057_vm6, %v6175_v36  ;;  %4565 = vmatmul.mubr.msk.f32.gmra.mrb[52].mxu1 %vm2057_vm6, %v6175_v36 }
 0x40f   : > { %4515 = vmatprep.mubr.msk.f32.mxu0 %vm2057_vm6, %v6179_v39  ;;  %4567 = vmatprep.mubr.msk.f32.mxu1 %vm2057_vm6, %v6179_v39 }
 0x412   : > { %4516 = vmatmul.mubr.msk.f32.gmra.mrb[54].mxu0 %vm2057_vm6, %v6191_v42  ;;  %4568 = vmatmul.mubr.msk.f32.gmra.mrb[54].mxu1 %vm2057_vm6, %v6191_v42 }
 0x413   : > { %4518 = vmatprep.mubr.msk.f32.mxu0 %vm2057_vm6, %v6193_v43  ;;  %4570 = vmatprep.mubr.msk.f32.mxu1 %vm2057_vm6, %v6193_v43 }
 0x416   : > { %4519 = vmatmul.mubr.msk.f32.gmra.mrb[56].mxu0 %vm2057_vm6, %v6204_v6  ;;  %4571 = vmatmul.mubr.msk.f32.gmra.mrb[56].mxu1 %vm2057_vm6, %v6204_v6 }
 0x417   : > { %4521 = vmatprep.mubr.msk.f32.mxu0 %vm2057_vm6, %v6206_v45  ;;  %4573 = vmatprep.mubr.msk.f32.mxu1 %vm2057_vm6, %v6206_v45 }
 0x41a   : > { %4522 = vmatmul.mubr.msk.f32.gmra.mrb[58].mxu0 %vm2057_vm6, %v6217_v46  ;;  %4574 = vmatmul.mubr.msk.f32.gmra.mrb[58].mxu1 %vm2057_vm6, %v6217_v46 }
 0x41b   : > { %4580 = vmatprep.mubr.msk.f32.mxu0 %vm2057_vm6, %v5980_v50  ;;  %4632 = vmatprep.mubr.msk.f32.mxu1 %vm2057_vm6, %v5980_v50  ;;  %v6354_v50 = vld [vmem:[%s6759_s10] ss:$0 sm:$0xff] }
 0x41e   : > { %4581 = vmatmul.mubr.msk.f32.vlgmr.msra.gmra.mrb[60].mxu0 %vm2057_vm6, %v5982_v15  ;;  %4633 = vmatmul.mubr.msk.f32.vlgmr.msra.gmra.mrb[60].mxu1 %vm2057_vm6, %v5982_v15 }
 0x41f   : > { %4583 = vmatprep.mubr.msk.f32.mxu0 %vm2057_vm6, %v5994_v20  ;;  %4635 = vmatprep.mubr.msk.f32.mxu1 %vm2057_vm6, %v5994_v20 }
 0x422   : > { %4584 = vmatmul.mubr.msk.f32.gmra.mrb[62].mxu0 %vm2057_vm6, %v5996_v21  ;;  %4636 = vmatmul.mubr.msk.f32.gmra.mrb[62].mxu1 %vm2057_vm6, %v5996_v21 }
 0x423   : > { %4586 = vmatprep.mubr.msk.f32.mxu0 %vm2057_vm6, %v6008_v28  ;;  %4638 = vmatprep.mubr.msk.f32.mxu1 %vm2057_vm6, %v6008_v28 }
 0x426   : > { %4587 = vmatmul.mubr.msk.f32.gmra.mrb[64].mxu0 %vm2057_vm6, %v6010_v31  ;;  %4639 = vmatmul.mubr.msk.f32.gmra.mrb[64].mxu1 %vm2057_vm6, %v6010_v31 }
 0x427   : > { %4589 = vmatprep.mubr.msk.f32.mxu0 %vm2057_vm6, %v6023_v37  ;;  %4641 = vmatprep.mubr.msk.f32.mxu1 %vm2057_vm6, %v6023_v37 }
 0x42a   : > { %4590 = vmatmul.mubr.msk.f32.gmra.mrb[66].mxu0 %vm2057_vm6, %v6028_v41  ;;  %4642 = vmatmul.mubr.msk.f32.gmra.mrb[66].mxu1 %vm2057_vm6, %v6028_v41 }
 0x42b   : > { %4592 = vmatprep.mubr.msk.f32.mxu0 %vm2057_vm6, %v6032_v44  ;;  %4644 = vmatprep.mubr.msk.f32.mxu1 %vm2057_vm6, %v6032_v44 }
 0x42e   : > { %4593 = vmatmul.mubr.msk.f32.gmra.mrb[68].mxu0 %vm2057_vm6, %v6049_v48  ;;  %4645 = vmatmul.mubr.msk.f32.gmra.mrb[68].mxu1 %vm2057_vm6, %v6049_v48 }
 0x42f   : > { %4595 = vmatprep.mubr.msk.f32.mxu0 %vm2057_vm6, %v6054_v53  ;;  %4647 = vmatprep.mubr.msk.f32.mxu1 %vm2057_vm6, %v6054_v53 }
 0x432   : > { %4596 = vmatmul.mubr.msk.f32.gmra.mrb[70].mxu0 %vm2057_vm6, %v6065_v57  ;;  %4648 = vmatmul.mubr.msk.f32.gmra.mrb[70].mxu1 %vm2057_vm6, %v6065_v57 }
 0x433   : > { %4598 = vmatprep.mubr.msk.f32.mxu0 %vm2057_vm6, %v6073_v62  ;;  %4650 = vmatprep.mubr.msk.f32.mxu1 %vm2057_vm6, %v6073_v62 }
 0x436   : > { %4599 = vmatmul.mubr.msk.f32.gmra.mrb[72].mxu0 %vm2057_vm6, %v6084_v2  ;;  %4651 = vmatmul.mubr.msk.f32.gmra.mrb[72].mxu1 %vm2057_vm6, %v6084_v2 }
 0x437   : > { %4601 = vmatprep.mubr.msk.f32.mxu0 %vm2057_vm6, %v6090_v8  ;;  %4653 = vmatprep.mubr.msk.f32.mxu1 %vm2057_vm6, %v6090_v8 }
 0x43a   : > { %4602 = vmatmul.mubr.msk.f32.gmra.mrb[74].mxu0 %vm2057_vm6, %v6102_v10  ;;  %4654 = vmatmul.mubr.msk.f32.gmra.mrb[74].mxu1 %vm2057_vm6, %v6102_v10 }
 0x43b   : > { %4604 = vmatprep.mubr.msk.f32.mxu0 %vm2057_vm6, %v6105_v13  ;;  %4656 = vmatprep.mubr.msk.f32.mxu1 %vm2057_vm6, %v6105_v13 }
 0x43e   : > { %4605 = vmatmul.mubr.msk.f32.gmra.mrb[76].mxu0 %vm2057_vm6, %v6116_v16  ;;  %4657 = vmatmul.mubr.msk.f32.gmra.mrb[76].mxu1 %vm2057_vm6, %v6116_v16 }
 0x43f   : > { %4607 = vmatprep.mubr.msk.f32.mxu0 %vm2057_vm6, %v6119_v18  ;;  %4659 = vmatprep.mubr.msk.f32.mxu1 %vm2057_vm6, %v6119_v18 }
 0x442   : > { %4608 = vmatmul.mubr.msk.f32.gmra.mrb[78].mxu0 %vm2057_vm6, %v6130_v22  ;;  %4660 = vmatmul.mubr.msk.f32.gmra.mrb[78].mxu1 %vm2057_vm6, %v6130_v22 }
 0x443   : > { %4610 = vmatprep.mubr.msk.f32.mxu0 %vm2057_vm6, %v6133_v24  ;;  %4662 = vmatprep.mubr.msk.f32.mxu1 %vm2057_vm6, %v6133_v24 }
 0x446   : > { %4611 = vmatmul.mubr.msk.f32.gmra.mrb[80].mxu0 %vm2057_vm6, %v6144_v26  ;;  %4663 = vmatmul.mubr.msk.f32.gmra.mrb[80].mxu1 %vm2057_vm6, %v6144_v26 }
 0x447   : > { %4613 = vmatprep.mubr.msk.f32.mxu0 %vm2057_vm6, %v6149_v30  ;;  %4665 = vmatprep.mubr.msk.f32.mxu1 %vm2057_vm6, %v6149_v30 }
 0x44a   : > { %4614 = vmatmul.mubr.msk.f32.gmra.mrb[82].mxu0 %vm2057_vm6, %v6161_v33  ;;  %4666 = vmatmul.mubr.msk.f32.gmra.mrb[82].mxu1 %vm2057_vm6, %v6161_v33 }
 0x44b   : > { %4616 = vmatprep.mubr.msk.f32.mxu0 %vm2057_vm6, %v6163_v34  ;;  %4668 = vmatprep.mubr.msk.f32.mxu1 %vm2057_vm6, %v6163_v34 }
 0x44e   : > { %4617 = vmatmul.mubr.msk.f32.gmra.mrb[84].mxu0 %vm2057_vm6, %v6175_v36  ;;  %4669 = vmatmul.mubr.msk.f32.gmra.mrb[84].mxu1 %vm2057_vm6, %v6175_v36 }
 0x44f   : > { %4619 = vmatprep.mubr.msk.f32.mxu0 %vm2057_vm6, %v6179_v39  ;;  %4671 = vmatprep.mubr.msk.f32.mxu1 %vm2057_vm6, %v6179_v39 }
 0x452   : > { %4620 = vmatmul.mubr.msk.f32.gmra.mrb[86].mxu0 %vm2057_vm6, %v6191_v42  ;;  %4672 = vmatmul.mubr.msk.f32.gmra.mrb[86].mxu1 %vm2057_vm6, %v6191_v42 }
 0x453   : > { %4622 = vmatprep.mubr.msk.f32.mxu0 %vm2057_vm6, %v6193_v43  ;;  %4674 = vmatprep.mubr.msk.f32.mxu1 %vm2057_vm6, %v6193_v43 }
 0x456   : > { %4623 = vmatmul.mubr.msk.f32.gmra.mrb[88].mxu0 %vm2057_vm6, %v6204_v6  ;;  %4675 = vmatmul.mubr.msk.f32.gmra.mrb[88].mxu1 %vm2057_vm6, %v6204_v6 }
 0x457   : > { %4625 = vmatprep.mubr.msk.f32.mxu0 %vm2057_vm6, %v6206_v45  ;;  %4677 = vmatprep.mubr.msk.f32.mxu1 %vm2057_vm6, %v6206_v45 }
 0x45a   : > { %4626 = vmatmul.mubr.msk.f32.gmra.mrb[90].mxu0 %vm2057_vm6, %v6217_v46  ;;  %4678 = vmatmul.mubr.msk.f32.gmra.mrb[90].mxu1 %vm2057_vm6, %v6217_v46 }
 0x4a9   : > { %v4478_v15 = vpop.f32.mrb[28].mxu0  ;;  %v4530_v20 = vpop.f32.mrb[28].mxu1 }
 0x4aa   : > { %v2226_v21 = vadd.f32 %v4478_v15, %v6354_v50  ;;  %v2486_v28 = vadd.f32 %v4530_v20, %v6354_v50  ;;  %v2220_v31 = vpop.f32.mrb[29].mxu0  ;;  %v2480_v37 = vpop.f32.mrb[29].mxu1 }
 0x4ab   : > { %v2221_v41 = vadd.f32 %v6354_v50, %v2220_v31  ;;  %v2481_v44 = vadd.f32 %v6354_v50, %v2480_v37 }
 0x4ac   : > { %v2380_v47 = vmax.f32 %v2226_v21, 0.0  ;;  %v2640_v48 = vmax.f32 %v2486_v28, 0.0 }
 0x4ad   : > { %v2379_v49 = vmax.f32 %v2221_v41, 0.0  ;;  %v2639_v51 = vmax.f32 %v2481_v44, 0.0  ;;  %v4481_v52 = vpop.f32.mrb[30].mxu0  ;;  %v4533_v53 = vpop.f32.mrb[30].mxu1 }
 0x4ae   : > { %3193 = vst.msk [vmem:[%s6362_s22 + $0x8] sm:$0xff] %vm3191_vm7, %v2380_v47  ;;  %3225 = vst.msk [vmem:[%s6362_s22 + $0x108] sm:$0xff] %vm3191_vm7, %v2640_v48  ;;  %v2236_v54 = vadd.f32 %v4481_v52, %v6354_v50  ;;  %v2496_v55 = vadd.f32 %v4533_v53, %v6354_v50  ;;  %v2230_v56 = vpop.f32.mrb[31].mxu0  ;;  %v2490_v57 = vpop.f32.mrb[31].mxu1 }
 0x4af   : > { %3192 = vst.msk [vmem:[%s6362_s22] sm:$0xff] %vm3191_vm7, %v2379_v49  ;;  %3224 = vst.msk [vmem:[%s6362_s22 + $0x100] sm:$0xff] %vm3191_vm7, %v2639_v51  ;;  %v2231_v58 = vadd.f32 %v6354_v50, %v2230_v56  ;;  %v2491_v59 = vadd.f32 %v6354_v50, %v2490_v57 }
 0x4b0   : > { %v2382_v60 = vmax.f32 %v2236_v54, 0.0  ;;  %v2642_v61 = vmax.f32 %v2496_v55, 0.0 }
 0x4b1   : > { %v2381_v62 = vmax.f32 %v2231_v58, 0.0  ;;  %v2641_v63 = vmax.f32 %v2491_v59, 0.0 }
 0x4b2   : > { %3195 = vst.msk [vmem:[%s6362_s22 + $0x18] sm:$0xff] %vm3191_vm7, %v2382_v60  ;;  %3227 = vst.msk [vmem:[%s6362_s22 + $0x118] sm:$0xff] %vm3191_vm7, %v2642_v61 }
 0x4b3   : > { %3194 = vst.msk [vmem:[%s6362_s22 + $0x10] sm:$0xff] %vm3191_vm7, %v2381_v62  ;;  %3226 = vst.msk [vmem:[%s6362_s22 + $0x110] sm:$0xff] %vm3191_vm7, %v2641_v63 }
 0x4b9   : > { %v4484_v0 = vpop.f32.mrb[32].mxu0  ;;  %v4536_v1 = vpop.f32.mrb[32].mxu1 }
 0x4ba   : > { %v2246_v2 = vadd.f32 %v4484_v0, %v6354_v50  ;;  %v2506_v3 = vadd.f32 %v4536_v1, %v6354_v50  ;;  %v2240_v4 = vpop.f32.mrb[33].mxu0  ;;  %v2500_v5 = vpop.f32.mrb[33].mxu1 }
 0x4bb   : > { %v2241_v7 = vadd.f32 %v6354_v50, %v2240_v4  ;;  %v2501_v8 = vadd.f32 %v6354_v50, %v2500_v5 }
 0x4bc   : > { %v2384_v9 = vmax.f32 %v2246_v2, 0.0  ;;  %v2644_v11 = vmax.f32 %v2506_v3, 0.0 }
 0x4bd   : > { %v2383_v10 = vmax.f32 %v2241_v7, 0.0  ;;  %v2643_v12 = vmax.f32 %v2501_v8, 0.0  ;;  %v4487_v13 = vpop.f32.mrb[34].mxu0  ;;  %v4539_v14 = vpop.f32.mrb[34].mxu1 }
 0x4be   : > { %3197 = vst.msk [vmem:[%s6362_s22 + $0x28] sm:$0xff] %vm3191_vm7, %v2384_v9  ;;  %3229 = vst.msk [vmem:[%s6362_s22 + $0x128] sm:$0xff] %vm3191_vm7, %v2644_v11  ;;  %v2256_v16 = vadd.f32 %v4487_v13, %v6354_v50  ;;  %v2516_v17 = vadd.f32 %v4539_v14, %v6354_v50  ;;  %v2250_v18 = vpop.f32.mrb[35].mxu0  ;;  %v2510_v19 = vpop.f32.mrb[35].mxu1 }
 0x4bf   : > { %3196 = vst.msk [vmem:[%s6362_s22 + $0x20] sm:$0xff] %vm3191_vm7, %v2383_v10  ;;  %3228 = vst.msk [vmem:[%s6362_s22 + $0x120] sm:$0xff] %vm3191_vm7, %v2643_v12  ;;  %v2251_v22 = vadd.f32 %v6354_v50, %v2250_v18  ;;  %v2511_v23 = vadd.f32 %v6354_v50, %v2510_v19 }
 0x4c0   : > { %v2386_v24 = vmax.f32 %v2256_v16, 0.0  ;;  %v2646_v25 = vmax.f32 %v2516_v17, 0.0 }
 0x4c1   : > { %v2385_v26 = vmax.f32 %v2251_v22, 0.0  ;;  %v2645_v27 = vmax.f32 %v2511_v23, 0.0  ;;  %v4490_v29 = vpop.f32.mrb[36].mxu0  ;;  %v4542_v30 = vpop.f32.mrb[36].mxu1 }
 0x4c2   : > { %3199 = vst.msk [vmem:[%s6362_s22 + $0x38] sm:$0xff] %vm3191_vm7, %v2386_v24  ;;  %3231 = vst.msk [vmem:[%s6362_s22 + $0x138] sm:$0xff] %vm3191_vm7, %v2646_v25  ;;  %v2266_v32 = vadd.f32 %v4490_v29, %v6354_v50  ;;  %v2526_v33 = vadd.f32 %v4542_v30, %v6354_v50  ;;  %v2260_v34 = vpop.f32.mrb[37].mxu0  ;;  %v2520_v35 = vpop.f32.mrb[37].mxu1 }
 0x4c3   : > { %3198 = vst.msk [vmem:[%s6362_s22 + $0x30] sm:$0xff] %vm3191_vm7, %v2385_v26  ;;  %3230 = vst.msk [vmem:[%s6362_s22 + $0x130] sm:$0xff] %vm3191_vm7, %v2645_v27  ;;  %v2261_v36 = vadd.f32 %v6354_v50, %v2260_v34  ;;  %v2521_v38 = vadd.f32 %v6354_v50, %v2520_v35 }
 0x4c4   : > { %v2388_v39 = vmax.f32 %v2266_v32, 0.0  ;;  %v2648_v40 = vmax.f32 %v2526_v33, 0.0 }
 0x4c5   : > { %v2387_v42 = vmax.f32 %v2261_v36, 0.0  ;;  %v2647_v43 = vmax.f32 %v2521_v38, 0.0  ;;  %v4493_v6 = vpop.f32.mrb[38].mxu0  ;;  %v4545_v45 = vpop.f32.mrb[38].mxu1 }
 0x4c6   : > { %3201 = vst.msk [vmem:[%s6362_s22 + $0x48] sm:$0xff] %vm3191_vm7, %v2388_v39  ;;  %3233 = vst.msk [vmem:[%s6362_s22 + $0x148] sm:$0xff] %vm3191_vm7, %v2648_v40  ;;  %v2276_v46 = vadd.f32 %v4493_v6, %v6354_v50  ;;  %v2536_v15 = vadd.f32 %v4545_v45, %v6354_v50  ;;  %v2270_v20 = vpop.f32.mrb[39].mxu0  ;;  %v2530_v21 = vpop.f32.mrb[39].mxu1 }
 0x4c7   : > { %3200 = vst.msk [vmem:[%s6362_s22 + $0x40] sm:$0xff] %vm3191_vm7, %v2387_v42  ;;  %3232 = vst.msk [vmem:[%s6362_s22 + $0x140] sm:$0xff] %vm3191_vm7, %v2647_v43  ;;  %v2271_v28 = vadd.f32 %v6354_v50, %v2270_v20  ;;  %v2531_v31 = vadd.f32 %v6354_v50, %v2530_v21 }
 0x4c8   : > { %v2390_v37 = vmax.f32 %v2276_v46, 0.0  ;;  %v2650_v41 = vmax.f32 %v2536_v15, 0.0 }
 0x4c9   : > { %v2389_v44 = vmax.f32 %v2271_v28, 0.0  ;;  %v2649_v47 = vmax.f32 %v2531_v31, 0.0  ;;  %v4496_v48 = vpop.f32.mrb[40].mxu0  ;;  %v4548_v49 = vpop.f32.mrb[40].mxu1 }
 0x4ca   : > { %3203 = vst.msk [vmem:[%s6362_s22 + $0x58] sm:$0xff] %vm3191_vm7, %v2390_v37  ;;  %3235 = vst.msk [vmem:[%s6362_s22 + $0x158] sm:$0xff] %vm3191_vm7, %v2650_v41  ;;  %v2286_v51 = vadd.f32 %v4496_v48, %v6354_v50  ;;  %v2546_v52 = vadd.f32 %v4548_v49, %v6354_v50  ;;  %v2280_v53 = vpop.f32.mrb[41].mxu0  ;;  %v2540_v54 = vpop.f32.mrb[41].mxu1 }
 0x4cb   : > { %3202 = vst.msk [vmem:[%s6362_s22 + $0x50] sm:$0xff] %vm3191_vm7, %v2389_v44  ;;  %3234 = vst.msk [vmem:[%s6362_s22 + $0x150] sm:$0xff] %vm3191_vm7, %v2649_v47  ;;  %v2281_v55 = vadd.f32 %v6354_v50, %v2280_v53  ;;  %v2541_v56 = vadd.f32 %v6354_v50, %v2540_v54 }
 0x4cc   : > { %v2392_v57 = vmax.f32 %v2286_v51, 0.0  ;;  %v2652_v58 = vmax.f32 %v2546_v52, 0.0 }
 0x4cd   : > { %v2391_v59 = vmax.f32 %v2281_v55, 0.0  ;;  %v2651_v60 = vmax.f32 %v2541_v56, 0.0  ;;  %v4499_v61 = vpop.f32.mrb[42].mxu0  ;;  %v4551_v62 = vpop.f32.mrb[42].mxu1 }
 0x4ce   : > { %3205 = vst.msk [vmem:[%s6362_s22 + $0x68] sm:$0xff] %vm3191_vm7, %v2392_v57  ;;  %3237 = vst.msk [vmem:[%s6362_s22 + $0x168] sm:$0xff] %vm3191_vm7, %v2652_v58  ;;  %v2296_v63 = vadd.f32 %v4499_v61, %v6354_v50  ;;  %v2556_v0 = vadd.f32 %v4551_v62, %v6354_v50  ;;  %v2290_v1 = vpop.f32.mrb[43].mxu0  ;;  %v2550_v2 = vpop.f32.mrb[43].mxu1 }
 0x4cf   : > { %3204 = vst.msk [vmem:[%s6362_s22 + $0x60] sm:$0xff] %vm3191_vm7, %v2391_v59  ;;  %3236 = vst.msk [vmem:[%s6362_s22 + $0x160] sm:$0xff] %vm3191_vm7, %v2651_v60  ;;  %v2291_v3 = vadd.f32 %v6354_v50, %v2290_v1  ;;  %v2551_v4 = vadd.f32 %v6354_v50, %v2550_v2 }
 0x4d0   : > { %v2394_v5 = vmax.f32 %v2296_v63, 0.0  ;;  %v2654_v7 = vmax.f32 %v2556_v0, 0.0 }
 0x4d1   : > { %v2393_v8 = vmax.f32 %v2291_v3, 0.0  ;;  %v2653_v9 = vmax.f32 %v2551_v4, 0.0  ;;  %v4502_v11 = vpop.f32.mrb[44].mxu0  ;;  %v4554_v10 = vpop.f32.mrb[44].mxu1 }
 0x4d2   : > { %3207 = vst.msk [vmem:[%s6362_s22 + $0x78] sm:$0xff] %vm3191_vm7, %v2394_v5  ;;  %3239 = vst.msk [vmem:[%s6362_s22 + $0x178] sm:$0xff] %vm3191_vm7, %v2654_v7  ;;  %v2306_v12 = vadd.f32 %v4502_v11, %v6354_v50  ;;  %v2566_v13 = vadd.f32 %v4554_v10, %v6354_v50  ;;  %v2300_v14 = vpop.f32.mrb[45].mxu0  ;;  %v2560_v16 = vpop.f32.mrb[45].mxu1 }
 0x4d3   : > { %3206 = vst.msk [vmem:[%s6362_s22 + $0x70] sm:$0xff] %vm3191_vm7, %v2393_v8  ;;  %3238 = vst.msk [vmem:[%s6362_s22 + $0x170] sm:$0xff] %vm3191_vm7, %v2653_v9  ;;  %v2301_v17 = vadd.f32 %v6354_v50, %v2300_v14  ;;  %v2561_v18 = vadd.f32 %v6354_v50, %v2560_v16 }
 0x4d4   : > { %v2396_v19 = vmax.f32 %v2306_v12, 0.0  ;;  %v2656_v22 = vmax.f32 %v2566_v13, 0.0 }
 0x4d5   : > { %v2395_v23 = vmax.f32 %v2301_v17, 0.0  ;;  %v2655_v24 = vmax.f32 %v2561_v18, 0.0  ;;  %v4505_v25 = vpop.f32.mrb[46].mxu0  ;;  %v4557_v26 = vpop.f32.mrb[46].mxu1 }
 0x4d6   : > { %3209 = vst.msk [vmem:[%s6362_s22 + $0x88] sm:$0xff] %vm3191_vm7, %v2396_v19  ;;  %3241 = vst.msk [vmem:[%s6362_s22 + $0x188] sm:$0xff] %vm3191_vm7, %v2656_v22  ;;  %v2316_v27 = vadd.f32 %v4505_v25, %v6354_v50  ;;  %v2576_v29 = vadd.f32 %v4557_v26, %v6354_v50  ;;  %v2310_v30 = vpop.f32.mrb[47].mxu0  ;;  %v2570_v32 = vpop.f32.mrb[47].mxu1 }
 0x4d7   : > { %3208 = vst.msk [vmem:[%s6362_s22 + $0x80] sm:$0xff] %vm3191_vm7, %v2395_v23  ;;  %3240 = vst.msk [vmem:[%s6362_s22 + $0x180] sm:$0xff] %vm3191_vm7, %v2655_v24  ;;  %v2311_v33 = vadd.f32 %v6354_v50, %v2310_v30  ;;  %v2571_v34 = vadd.f32 %v6354_v50, %v2570_v32 }
 0x4d8   : > { %v2398_v35 = vmax.f32 %v2316_v27, 0.0  ;;  %v2658_v36 = vmax.f32 %v2576_v29, 0.0 }
 0x4d9   : > { %v2397_v38 = vmax.f32 %v2311_v33, 0.0  ;;  %v2657_v39 = vmax.f32 %v2571_v34, 0.0  ;;  %v4508_v40 = vpop.f32.mrb[48].mxu0  ;;  %v4560_v42 = vpop.f32.mrb[48].mxu1 }
 0x4da   : > { %3211 = vst.msk [vmem:[%s6362_s22 + $0x98] sm:$0xff] %vm3191_vm7, %v2398_v35  ;;  %3243 = vst.msk [vmem:[%s6362_s22 + $0x198] sm:$0xff] %vm3191_vm7, %v2658_v36  ;;  %v2326_v43 = vadd.f32 %v4508_v40, %v6354_v50  ;;  %v2586_v6 = vadd.f32 %v4560_v42, %v6354_v50  ;;  %v2320_v45 = vpop.f32.mrb[49].mxu0  ;;  %v2580_v46 = vpop.f32.mrb[49].mxu1 }
 0x4db   : > { %3210 = vst.msk [vmem:[%s6362_s22 + $0x90] sm:$0xff] %vm3191_vm7, %v2397_v38  ;;  %3242 = vst.msk [vmem:[%s6362_s22 + $0x190] sm:$0xff] %vm3191_vm7, %v2657_v39  ;;  %v2321_v15 = vadd.f32 %v6354_v50, %v2320_v45  ;;  %v2581_v20 = vadd.f32 %v6354_v50, %v2580_v46 }
 0x4dc   : > { %v2400_v21 = vmax.f32 %v2326_v43, 0.0  ;;  %v2660_v28 = vmax.f32 %v2586_v6, 0.0 }
 0x4dd   : > { %v2399_v31 = vmax.f32 %v2321_v15, 0.0  ;;  %v2659_v37 = vmax.f32 %v2581_v20, 0.0  ;;  %v4511_v41 = vpop.f32.mrb[50].mxu0  ;;  %v4563_v44 = vpop.f32.mrb[50].mxu1 }
 0x4de   : > { %3213 = vst.msk [vmem:[%s6362_s22 + $0xa8] sm:$0xff] %vm3191_vm7, %v2400_v21  ;;  %3245 = vst.msk [vmem:[%s6362_s22 + $0x1a8] sm:$0xff] %vm3191_vm7, %v2660_v28  ;;  %v2336_v47 = vadd.f32 %v4511_v41, %v6354_v50  ;;  %v2596_v48 = vadd.f32 %v4563_v44, %v6354_v50  ;;  %v2330_v49 = vpop.f32.mrb[51].mxu0  ;;  %v2590_v51 = vpop.f32.mrb[51].mxu1 }
 0x4df   : > { %3212 = vst.msk [vmem:[%s6362_s22 + $0xa0] sm:$0xff] %vm3191_vm7, %v2399_v31  ;;  %3244 = vst.msk [vmem:[%s6362_s22 + $0x1a0] sm:$0xff] %vm3191_vm7, %v2659_v37  ;;  %v2331_v52 = vadd.f32 %v6354_v50, %v2330_v49  ;;  %v2591_v53 = vadd.f32 %v6354_v50, %v2590_v51 }
 0x4e0   : > { %v2402_v54 = vmax.f32 %v2336_v47, 0.0  ;;  %v2662_v55 = vmax.f32 %v2596_v48, 0.0 }
 0x4e1   : > { %v2401_v56 = vmax.f32 %v2331_v52, 0.0  ;;  %v2661_v57 = vmax.f32 %v2591_v53, 0.0  ;;  %v4514_v58 = vpop.f32.mrb[52].mxu0  ;;  %v4566_v59 = vpop.f32.mrb[52].mxu1 }
 0x4e2   : > { %3215 = vst.msk [vmem:[%s6362_s22 + $0xb8] sm:$0xff] %vm3191_vm7, %v2402_v54  ;;  %3247 = vst.msk [vmem:[%s6362_s22 + $0x1b8] sm:$0xff] %vm3191_vm7, %v2662_v55  ;;  %v2346_v60 = vadd.f32 %v4514_v58, %v6354_v50  ;;  %v2606_v61 = vadd.f32 %v4566_v59, %v6354_v50  ;;  %v2340_v62 = vpop.f32.mrb[53].mxu0  ;;  %v2600_v63 = vpop.f32.mrb[53].mxu1 }
 0x4e3   : > { %3214 = vst.msk [vmem:[%s6362_s22 + $0xb0] sm:$0xff] %vm3191_vm7, %v2401_v56  ;;  %3246 = vst.msk [vmem:[%s6362_s22 + $0x1b0] sm:$0xff] %vm3191_vm7, %v2661_v57  ;;  %v2341_v0 = vadd.f32 %v6354_v50, %v2340_v62  ;;  %v2601_v1 = vadd.f32 %v6354_v50, %v2600_v63 }
 0x4e4   : > { %v2404_v2 = vmax.f32 %v2346_v60, 0.0  ;;  %v2664_v3 = vmax.f32 %v2606_v61, 0.0 }
 0x4e5   : > { %v2403_v4 = vmax.f32 %v2341_v0, 0.0  ;;  %v2663_v5 = vmax.f32 %v2601_v1, 0.0  ;;  %v4517_v7 = vpop.f32.mrb[54].mxu0  ;;  %v4569_v8 = vpop.f32.mrb[54].mxu1 }
 0x4e6   : > { %3217 = vst.msk [vmem:[%s6362_s22 + $0xc8] sm:$0xff] %vm3191_vm7, %v2404_v2  ;;  %3249 = vst.msk [vmem:[%s6362_s22 + $0x1c8] sm:$0xff] %vm3191_vm7, %v2664_v3  ;;  %v2356_v9 = vadd.f32 %v4517_v7, %v6354_v50  ;;  %v2616_v11 = vadd.f32 %v4569_v8, %v6354_v50  ;;  %v2350_v10 = vpop.f32.mrb[55].mxu0  ;;  %v2610_v12 = vpop.f32.mrb[55].mxu1 }
 0x4e7   : > { %3216 = vst.msk [vmem:[%s6362_s22 + $0xc0] sm:$0xff] %vm3191_vm7, %v2403_v4  ;;  %3248 = vst.msk [vmem:[%s6362_s22 + $0x1c0] sm:$0xff] %vm3191_vm7, %v2663_v5  ;;  %v2351_v13 = vadd.f32 %v6354_v50, %v2350_v10  ;;  %v2611_v14 = vadd.f32 %v6354_v50, %v2610_v12 }
 0x4e8   : > { %v2406_v16 = vmax.f32 %v2356_v9, 0.0  ;;  %v2666_v17 = vmax.f32 %v2616_v11, 0.0 }
 0x4e9   : > { %v2405_v18 = vmax.f32 %v2351_v13, 0.0  ;;  %v2665_v19 = vmax.f32 %v2611_v14, 0.0  ;;  %v4520_v22 = vpop.f32.mrb[56].mxu0  ;;  %v4572_v23 = vpop.f32.mrb[56].mxu1 }
 0x4ea   : > { %3219 = vst.msk [vmem:[%s6362_s22 + $0xd8] sm:$0xff] %vm3191_vm7, %v2406_v16  ;;  %3251 = vst.msk [vmem:[%s6362_s22 + $0x1d8] sm:$0xff] %vm3191_vm7, %v2666_v17  ;;  %v2366_v24 = vadd.f32 %v4520_v22, %v6354_v50  ;;  %v2626_v25 = vadd.f32 %v4572_v23, %v6354_v50  ;;  %v2360_v26 = vpop.f32.mrb[57].mxu0  ;;  %v2620_v27 = vpop.f32.mrb[57].mxu1 }
 0x4eb   : > { %3218 = vst.msk [vmem:[%s6362_s22 + $0xd0] sm:$0xff] %vm3191_vm7, %v2405_v18  ;;  %3250 = vst.msk [vmem:[%s6362_s22 + $0x1d0] sm:$0xff] %vm3191_vm7, %v2665_v19  ;;  %v2361_v29 = vadd.f32 %v6354_v50, %v2360_v26  ;;  %v2621_v30 = vadd.f32 %v6354_v50, %v2620_v27 }
 0x4ec   : > { %v2408_v32 = vmax.f32 %v2366_v24, 0.0  ;;  %v2668_v33 = vmax.f32 %v2626_v25, 0.0 }
 0x4ed   : > { %v2407_v34 = vmax.f32 %v2361_v29, 0.0  ;;  %v2667_v35 = vmax.f32 %v2621_v30, 0.0  ;;  %v4523_v36 = vpop.f32.mrb[58].mxu0  ;;  %v4575_v38 = vpop.f32.mrb[58].mxu1 }
 0x4ee   : > { %3221 = vst.msk [vmem:[%s6362_s22 + $0xe8] sm:$0xff] %vm3191_vm7, %v2408_v32  ;;  %3253 = vst.msk [vmem:[%s6362_s22 + $0x1e8] sm:$0xff] %vm3191_vm7, %v2668_v33  ;;  %v2376_v39 = vadd.f32 %v4523_v36, %v6354_v50  ;;  %v2636_v40 = vadd.f32 %v4575_v38, %v6354_v50  ;;  %v2370_v42 = vpop.f32.mrb[59].mxu0  ;;  %v2630_v43 = vpop.f32.mrb[59].mxu1 }
 0x4ef   : > { %3220 = vst.msk [vmem:[%s6362_s22 + $0xe0] sm:$0xff] %vm3191_vm7, %v2407_v34  ;;  %3252 = vst.msk [vmem:[%s6362_s22 + $0x1e0] sm:$0xff] %vm3191_vm7, %v2667_v35  ;;  %v2371_v6 = vadd.f32 %v6354_v50, %v2370_v42  ;;  %v2631_v45 = vadd.f32 %v6354_v50, %v2630_v43 }
 0x4f0   : > { %v2410_v46 = vmax.f32 %v2376_v39, 0.0  ;;  %v2670_v15 = vmax.f32 %v2636_v40, 0.0 }
 0x4f1   : > { %v2409_v20 = vmax.f32 %v2371_v6, 0.0  ;;  %v2669_v21 = vmax.f32 %v2631_v45, 0.0  ;;  %v4582_v28 = vpop.f32.mrb[60].mxu0  ;;  %v4634_v31 = vpop.f32.mrb[60].mxu1 }
 0x4f2   : > { %3223 = vst.msk [vmem:[%s6362_s22 + $0xf8] sm:$0xff] %vm3191_vm7, %v2410_v46  ;;  %3255 = vst.msk [vmem:[%s6362_s22 + $0x1f8] sm:$0xff] %vm3191_vm7, %v2670_v15  ;;  %v2746_v37 = vadd.f32 %v4582_v28, %v6354_v50  ;;  %v3006_v41 = vadd.f32 %v4634_v31, %v6354_v50  ;;  %v2740_v44 = vpop.f32.mrb[61].mxu0  ;;  %v3000_v47 = vpop.f32.mrb[61].mxu1 }
 0x4f3   : > { %3222 = vst.msk [vmem:[%s6362_s22 + $0xf0] sm:$0xff] %vm3191_vm7, %v2409_v20  ;;  %3254 = vst.msk [vmem:[%s6362_s22 + $0x1f0] sm:$0xff] %vm3191_vm7, %v2669_v21  ;;  %v2741_v48 = vadd.f32 %v6354_v50, %v2740_v44  ;;  %v3001_v49 = vadd.f32 %v6354_v50, %v3000_v47 }
 0x4f4   : > { %v2900_v51 = vmax.f32 %v2746_v37, 0.0  ;;  %v3160_v52 = vmax.f32 %v3006_v41, 0.0 }
 0x4f5   : > { %v2899_v53 = vmax.f32 %v2741_v48, 0.0  ;;  %v3159_v54 = vmax.f32 %v3001_v49, 0.0  ;;  %v4585_v55 = vpop.f32.mrb[62].mxu0  ;;  %v4637_v56 = vpop.f32.mrb[62].mxu1 }
 0x4f6   : > { %3257 = vst.msk [vmem:[%s6362_s22 + $0x208] sm:$0xff] %vm3191_vm7, %v2900_v51  ;;  %3289 = vst.msk [vmem:[%s6362_s22 + $0x308] sm:$0xff] %vm3191_vm7, %v3160_v52  ;;  %v2756_v57 = vadd.f32 %v4585_v55, %v6354_v50  ;;  %v3016_v58 = vadd.f32 %v4637_v56, %v6354_v50  ;;  %v2750_v59 = vpop.f32.mrb[63].mxu0  ;;  %v3010_v60 = vpop.f32.mrb[63].mxu1 }
 0x4f7   : > { %3256 = vst.msk [vmem:[%s6362_s22 + $0x200] sm:$0xff] %vm3191_vm7, %v2899_v53  ;;  %3288 = vst.msk [vmem:[%s6362_s22 + $0x300] sm:$0xff] %vm3191_vm7, %v3159_v54  ;;  %v2751_v61 = vadd.f32 %v6354_v50, %v2750_v59  ;;  %v3011_v62 = vadd.f32 %v6354_v50, %v3010_v60 }
 0x4f8   : > { %v2902_v63 = vmax.f32 %v2756_v57, 0.0  ;;  %v3162_v0 = vmax.f32 %v3016_v58, 0.0 }
 0x4f9   : > { %v2901_v1 = vmax.f32 %v2751_v61, 0.0  ;;  %v3161_v2 = vmax.f32 %v3011_v62, 0.0  ;;  %v4588_v3 = vpop.f32.mrb[64].mxu0  ;;  %v4640_v4 = vpop.f32.mrb[64].mxu1 }
 0x4fa   : > { %3259 = vst.msk [vmem:[%s6362_s22 + $0x218] sm:$0xff] %vm3191_vm7, %v2902_v63  ;;  %3291 = vst.msk [vmem:[%s6362_s22 + $0x318] sm:$0xff] %vm3191_vm7, %v3162_v0  ;;  %v2766_v5 = vadd.f32 %v4588_v3, %v6354_v50  ;;  %v3026_v7 = vadd.f32 %v4640_v4, %v6354_v50  ;;  %v2760_v8 = vpop.f32.mrb[65].mxu0  ;;  %v3020_v9 = vpop.f32.mrb[65].mxu1 }
 0x4fb   : > { %3258 = vst.msk [vmem:[%s6362_s22 + $0x210] sm:$0xff] %vm3191_vm7, %v2901_v1  ;;  %3290 = vst.msk [vmem:[%s6362_s22 + $0x310] sm:$0xff] %vm3191_vm7, %v3161_v2  ;;  %v2761_v11 = vadd.f32 %v6354_v50, %v2760_v8  ;;  %v3021_v10 = vadd.f32 %v6354_v50, %v3020_v9 }
 0x4fc   : > { %v2904_v12 = vmax.f32 %v2766_v5, 0.0  ;;  %v3164_v13 = vmax.f32 %v3026_v7, 0.0 }
 0x4fd   : > { %v2903_v14 = vmax.f32 %v2761_v11, 0.0  ;;  %v3163_v16 = vmax.f32 %v3021_v10, 0.0  ;;  %v4591_v17 = vpop.f32.mrb[66].mxu0  ;;  %v4643_v18 = vpop.f32.mrb[66].mxu1 }
 0x4fe   : > { %3261 = vst.msk [vmem:[%s6362_s22 + $0x228] sm:$0xff] %vm3191_vm7, %v2904_v12  ;;  %3293 = vst.msk [vmem:[%s6362_s22 + $0x328] sm:$0xff] %vm3191_vm7, %v3164_v13  ;;  %v2776_v19 = vadd.f32 %v4591_v17, %v6354_v50  ;;  %v3036_v22 = vadd.f32 %v4643_v18, %v6354_v50  ;;  %v2770_v23 = vpop.f32.mrb[67].mxu0  ;;  %v3030_v24 = vpop.f32.mrb[67].mxu1 }
 0x4ff   : > { %3260 = vst.msk [vmem:[%s6362_s22 + $0x220] sm:$0xff] %vm3191_vm7, %v2903_v14  ;;  %3292 = vst.msk [vmem:[%s6362_s22 + $0x320] sm:$0xff] %vm3191_vm7, %v3163_v16  ;;  %v2771_v25 = vadd.f32 %v6354_v50, %v2770_v23  ;;  %v3031_v26 = vadd.f32 %v6354_v50, %v3030_v24 }
 0x500   : > { %v2906_v27 = vmax.f32 %v2776_v19, 0.0  ;;  %v3166_v29 = vmax.f32 %v3036_v22, 0.0 }
 0x501   : > { %v2905_v30 = vmax.f32 %v2771_v25, 0.0  ;;  %v3165_v32 = vmax.f32 %v3031_v26, 0.0  ;;  %v4594_v33 = vpop.f32.mrb[68].mxu0  ;;  %v4646_v34 = vpop.f32.mrb[68].mxu1 }
 0x502   : > { %3263 = vst.msk [vmem:[%s6362_s22 + $0x238] sm:$0xff] %vm3191_vm7, %v2906_v27  ;;  %3295 = vst.msk [vmem:[%s6362_s22 + $0x338] sm:$0xff] %vm3191_vm7, %v3166_v29  ;;  %v2786_v35 = vadd.f32 %v4594_v33, %v6354_v50  ;;  %v3046_v36 = vadd.f32 %v4646_v34, %v6354_v50  ;;  %v2780_v38 = vpop.f32.mrb[69].mxu0  ;;  %v3040_v39 = vpop.f32.mrb[69].mxu1 }
 0x503   : > { %3262 = vst.msk [vmem:[%s6362_s22 + $0x230] sm:$0xff] %vm3191_vm7, %v2905_v30  ;;  %3294 = vst.msk [vmem:[%s6362_s22 + $0x330] sm:$0xff] %vm3191_vm7, %v3165_v32  ;;  %v2781_v40 = vadd.f32 %v6354_v50, %v2780_v38  ;;  %v3041_v42 = vadd.f32 %v6354_v50, %v3040_v39 }
 0x504   : > { %v2908_v43 = vmax.f32 %v2786_v35, 0.0  ;;  %v3168_v6 = vmax.f32 %v3046_v36, 0.0 }
 0x505   : > { %v2907_v45 = vmax.f32 %v2781_v40, 0.0  ;;  %v3167_v46 = vmax.f32 %v3041_v42, 0.0  ;;  %v4597_v15 = vpop.f32.mrb[70].mxu0  ;;  %v4649_v20 = vpop.f32.mrb[70].mxu1 }
 0x506   : > { %3265 = vst.msk [vmem:[%s6362_s22 + $0x248] sm:$0xff] %vm3191_vm7, %v2908_v43  ;;  %3297 = vst.msk [vmem:[%s6362_s22 + $0x348] sm:$0xff] %vm3191_vm7, %v3168_v6  ;;  %v2796_v21 = vadd.f32 %v4597_v15, %v6354_v50  ;;  %v3056_v28 = vadd.f32 %v4649_v20, %v6354_v50  ;;  %v2790_v31 = vpop.f32.mrb[71].mxu0  ;;  %v3050_v37 = vpop.f32.mrb[71].mxu1 }
 0x507   : > { %3264 = vst.msk [vmem:[%s6362_s22 + $0x240] sm:$0xff] %vm3191_vm7, %v2907_v45  ;;  %3296 = vst.msk [vmem:[%s6362_s22 + $0x340] sm:$0xff] %vm3191_vm7, %v3167_v46  ;;  %v2791_v41 = vadd.f32 %v6354_v50, %v2790_v31  ;;  %v3051_v44 = vadd.f32 %v6354_v50, %v3050_v37 }
 0x508   : > { %v2910_v47 = vmax.f32 %v2796_v21, 0.0  ;;  %v3170_v48 = vmax.f32 %v3056_v28, 0.0 }
 0x509   : > { %v2909_v49 = vmax.f32 %v2791_v41, 0.0  ;;  %v3169_v51 = vmax.f32 %v3051_v44, 0.0  ;;  %v4600_v52 = vpop.f32.mrb[72].mxu0  ;;  %v4652_v53 = vpop.f32.mrb[72].mxu1 }
 0x50a   : > { %3267 = vst.msk [vmem:[%s6362_s22 + $0x258] sm:$0xff] %vm3191_vm7, %v2910_v47  ;;  %3299 = vst.msk [vmem:[%s6362_s22 + $0x358] sm:$0xff] %vm3191_vm7, %v3170_v48  ;;  %v2806_v54 = vadd.f32 %v4600_v52, %v6354_v50  ;;  %v3066_v55 = vadd.f32 %v4652_v53, %v6354_v50  ;;  %v2800_v56 = vpop.f32.mrb[73].mxu0  ;;  %v3060_v57 = vpop.f32.mrb[73].mxu1 }
 0x50b   : > { %3266 = vst.msk [vmem:[%s6362_s22 + $0x250] sm:$0xff] %vm3191_vm7, %v2909_v49  ;;  %3298 = vst.msk [vmem:[%s6362_s22 + $0x350] sm:$0xff] %vm3191_vm7, %v3169_v51  ;;  %v2801_v58 = vadd.f32 %v6354_v50, %v2800_v56  ;;  %v3061_v59 = vadd.f32 %v6354_v50, %v3060_v57 }
 0x50c   : > { %v2912_v60 = vmax.f32 %v2806_v54, 0.0  ;;  %v3172_v61 = vmax.f32 %v3066_v55, 0.0 }
 0x50d   : > { %v2911_v62 = vmax.f32 %v2801_v58, 0.0  ;;  %v3171_v63 = vmax.f32 %v3061_v59, 0.0  ;;  %v4603_v0 = vpop.f32.mrb[74].mxu0  ;;  %v4655_v1 = vpop.f32.mrb[74].mxu1 }
 0x50e   : > { %3269 = vst.msk [vmem:[%s6362_s22 + $0x268] sm:$0xff] %vm3191_vm7, %v2912_v60  ;;  %3301 = vst.msk [vmem:[%s6362_s22 + $0x368] sm:$0xff] %vm3191_vm7, %v3172_v61  ;;  %v2816_v2 = vadd.f32 %v4603_v0, %v6354_v50  ;;  %v3076_v3 = vadd.f32 %v4655_v1, %v6354_v50  ;;  %v2810_v4 = vpop.f32.mrb[75].mxu0  ;;  %v3070_v5 = vpop.f32.mrb[75].mxu1 }
 0x50f   : > { %3268 = vst.msk [vmem:[%s6362_s22 + $0x260] sm:$0xff] %vm3191_vm7, %v2911_v62  ;;  %3300 = vst.msk [vmem:[%s6362_s22 + $0x360] sm:$0xff] %vm3191_vm7, %v3171_v63  ;;  %v2811_v7 = vadd.f32 %v6354_v50, %v2810_v4  ;;  %v3071_v8 = vadd.f32 %v6354_v50, %v3070_v5 }
 0x510   : > { %v2914_v9 = vmax.f32 %v2816_v2, 0.0  ;;  %v3174_v11 = vmax.f32 %v3076_v3, 0.0 }
 0x511   : > { %v2913_v10 = vmax.f32 %v2811_v7, 0.0  ;;  %v3173_v12 = vmax.f32 %v3071_v8, 0.0  ;;  %v4606_v13 = vpop.f32.mrb[76].mxu0  ;;  %v4658_v14 = vpop.f32.mrb[76].mxu1 }
 0x512   : > { %3271 = vst.msk [vmem:[%s6362_s22 + $0x278] sm:$0xff] %vm3191_vm7, %v2914_v9  ;;  %3303 = vst.msk [vmem:[%s6362_s22 + $0x378] sm:$0xff] %vm3191_vm7, %v3174_v11  ;;  %v2826_v16 = vadd.f32 %v4606_v13, %v6354_v50  ;;  %v3086_v17 = vadd.f32 %v4658_v14, %v6354_v50  ;;  %v2820_v18 = vpop.f32.mrb[77].mxu0  ;;  %v3080_v19 = vpop.f32.mrb[77].mxu1 }
 0x513   : > { %3270 = vst.msk [vmem:[%s6362_s22 + $0x270] sm:$0xff] %vm3191_vm7, %v2913_v10  ;;  %3302 = vst.msk [vmem:[%s6362_s22 + $0x370] sm:$0xff] %vm3191_vm7, %v3173_v12  ;;  %v2821_v22 = vadd.f32 %v6354_v50, %v2820_v18  ;;  %v3081_v23 = vadd.f32 %v6354_v50, %v3080_v19 }
 0x514   : > { %v2916_v24 = vmax.f32 %v2826_v16, 0.0  ;;  %v3176_v25 = vmax.f32 %v3086_v17, 0.0 }
 0x515   : > { %v2915_v26 = vmax.f32 %v2821_v22, 0.0  ;;  %v3175_v27 = vmax.f32 %v3081_v23, 0.0  ;;  %v4609_v29 = vpop.f32.mrb[78].mxu0  ;;  %v4661_v30 = vpop.f32.mrb[78].mxu1 }
 0x516   : > { %3273 = vst.msk [vmem:[%s6362_s22 + $0x288] sm:$0xff] %vm3191_vm7, %v2916_v24  ;;  %3305 = vst.msk [vmem:[%s6362_s22 + $0x388] sm:$0xff] %vm3191_vm7, %v3176_v25  ;;  %v2836_v32 = vadd.f32 %v4609_v29, %v6354_v50  ;;  %v3096_v33 = vadd.f32 %v4661_v30, %v6354_v50  ;;  %v2830_v34 = vpop.f32.mrb[79].mxu0  ;;  %v3090_v35 = vpop.f32.mrb[79].mxu1 }
 0x517   : > { %3272 = vst.msk [vmem:[%s6362_s22 + $0x280] sm:$0xff] %vm3191_vm7, %v2915_v26  ;;  %3304 = vst.msk [vmem:[%s6362_s22 + $0x380] sm:$0xff] %vm3191_vm7, %v3175_v27  ;;  %v2831_v36 = vadd.f32 %v6354_v50, %v2830_v34  ;;  %v3091_v38 = vadd.f32 %v6354_v50, %v3090_v35 }
 0x518   : > { %v2918_v39 = vmax.f32 %v2836_v32, 0.0  ;;  %v3178_v40 = vmax.f32 %v3096_v33, 0.0 }
 0x519   : > { %v2917_v42 = vmax.f32 %v2831_v36, 0.0  ;;  %v3177_v43 = vmax.f32 %v3091_v38, 0.0  ;;  %v4612_v6 = vpop.f32.mrb[80].mxu0  ;;  %v4664_v45 = vpop.f32.mrb[80].mxu1 }
 0x51a   : > { %3275 = vst.msk [vmem:[%s6362_s22 + $0x298] sm:$0xff] %vm3191_vm7, %v2918_v39  ;;  %3307 = vst.msk [vmem:[%s6362_s22 + $0x398] sm:$0xff] %vm3191_vm7, %v3178_v40  ;;  %v2846_v46 = vadd.f32 %v4612_v6, %v6354_v50  ;;  %v3106_v15 = vadd.f32 %v4664_v45, %v6354_v50  ;;  %v2840_v20 = vpop.f32.mrb[81].mxu0  ;;  %v3100_v21 = vpop.f32.mrb[81].mxu1 }
 0x51b   : > { %3274 = vst.msk [vmem:[%s6362_s22 + $0x290] sm:$0xff] %vm3191_vm7, %v2917_v42  ;;  %3306 = vst.msk [vmem:[%s6362_s22 + $0x390] sm:$0xff] %vm3191_vm7, %v3177_v43  ;;  %v2841_v28 = vadd.f32 %v6354_v50, %v2840_v20  ;;  %v3101_v31 = vadd.f32 %v6354_v50, %v3100_v21 }
 0x51c   : > { %v2920_v37 = vmax.f32 %v2846_v46, 0.0  ;;  %v3180_v41 = vmax.f32 %v3106_v15, 0.0 }
 0x51d   : > { %v2919_v44 = vmax.f32 %v2841_v28, 0.0  ;;  %v3179_v47 = vmax.f32 %v3101_v31, 0.0  ;;  %v4615_v48 = vpop.f32.mrb[82].mxu0  ;;  %v4667_v49 = vpop.f32.mrb[82].mxu1 }
 0x51e   : > { %3277 = vst.msk [vmem:[%s6362_s22 + $0x2a8] sm:$0xff] %vm3191_vm7, %v2920_v37  ;;  %3309 = vst.msk [vmem:[%s6362_s22 + $0x3a8] sm:$0xff] %vm3191_vm7, %v3180_v41  ;;  %v2856_v51 = vadd.f32 %v4615_v48, %v6354_v50  ;;  %v3116_v52 = vadd.f32 %v4667_v49, %v6354_v50  ;;  %v2850_v53 = vpop.f32.mrb[83].mxu0  ;;  %v3110_v54 = vpop.f32.mrb[83].mxu1 }
 0x51f   : > { %3276 = vst.msk [vmem:[%s6362_s22 + $0x2a0] sm:$0xff] %vm3191_vm7, %v2919_v44  ;;  %3308 = vst.msk [vmem:[%s6362_s22 + $0x3a0] sm:$0xff] %vm3191_vm7, %v3179_v47  ;;  %v2851_v55 = vadd.f32 %v6354_v50, %v2850_v53  ;;  %v3111_v56 = vadd.f32 %v6354_v50, %v3110_v54 }
 0x520   : > { %v2922_v57 = vmax.f32 %v2856_v51, 0.0  ;;  %v3182_v58 = vmax.f32 %v3116_v52, 0.0 }
 0x521   : > { %v2921_v59 = vmax.f32 %v2851_v55, 0.0  ;;  %v3181_v60 = vmax.f32 %v3111_v56, 0.0  ;;  %v4618_v61 = vpop.f32.mrb[84].mxu0  ;;  %v4670_v62 = vpop.f32.mrb[84].mxu1 }
 0x522   : > { %3279 = vst.msk [vmem:[%s6362_s22 + $0x2b8] sm:$0xff] %vm3191_vm7, %v2922_v57  ;;  %3311 = vst.msk [vmem:[%s6362_s22 + $0x3b8] sm:$0xff] %vm3191_vm7, %v3182_v58  ;;  %v2866_v63 = vadd.f32 %v4618_v61, %v6354_v50  ;;  %v3126_v0 = vadd.f32 %v4670_v62, %v6354_v50  ;;  %v2860_v1 = vpop.f32.mrb[85].mxu0  ;;  %v3120_v2 = vpop.f32.mrb[85].mxu1 }
 0x523   : > { %3278 = vst.msk [vmem:[%s6362_s22 + $0x2b0] sm:$0xff] %vm3191_vm7, %v2921_v59  ;;  %3310 = vst.msk [vmem:[%s6362_s22 + $0x3b0] sm:$0xff] %vm3191_vm7, %v3181_v60  ;;  %v2861_v3 = vadd.f32 %v6354_v50, %v2860_v1  ;;  %v3121_v4 = vadd.f32 %v6354_v50, %v3120_v2 }
 0x524   : > { %v2924_v5 = vmax.f32 %v2866_v63, 0.0  ;;  %v3184_v7 = vmax.f32 %v3126_v0, 0.0 }
 0x525   : > { %v2923_v8 = vmax.f32 %v2861_v3, 0.0  ;;  %v3183_v9 = vmax.f32 %v3121_v4, 0.0  ;;  %v4621_v11 = vpop.f32.mrb[86].mxu0  ;;  %v4673_v10 = vpop.f32.mrb[86].mxu1 }
 0x526   : > { %3281 = vst.msk [vmem:[%s6362_s22 + $0x2c8] sm:$0xff] %vm3191_vm7, %v2924_v5  ;;  %3313 = vst.msk [vmem:[%s6362_s22 + $0x3c8] sm:$0xff] %vm3191_vm7, %v3184_v7  ;;  %v2876_v12 = vadd.f32 %v4621_v11, %v6354_v50  ;;  %v3136_v13 = vadd.f32 %v4673_v10, %v6354_v50  ;;  %v2870_v14 = vpop.f32.mrb[87].mxu0  ;;  %v3130_v16 = vpop.f32.mrb[87].mxu1 }
 0x527   : > { %3280 = vst.msk [vmem:[%s6362_s22 + $0x2c0] sm:$0xff] %vm3191_vm7, %v2923_v8  ;;  %3312 = vst.msk [vmem:[%s6362_s22 + $0x3c0] sm:$0xff] %vm3191_vm7, %v3183_v9  ;;  %v2871_v17 = vadd.f32 %v6354_v50, %v2870_v14  ;;  %v3131_v18 = vadd.f32 %v6354_v50, %v3130_v16 }
 0x528   : > { %v2926_v19 = vmax.f32 %v2876_v12, 0.0  ;;  %v3186_v22 = vmax.f32 %v3136_v13, 0.0 }
 0x529   : > { %v2925_v23 = vmax.f32 %v2871_v17, 0.0  ;;  %v3185_v24 = vmax.f32 %v3131_v18, 0.0  ;;  %v4624_v25 = vpop.f32.mrb[88].mxu0  ;;  %v4676_v26 = vpop.f32.mrb[88].mxu1 }
 0x52a   : > { %3283 = vst.msk [vmem:[%s6362_s22 + $0x2d8] sm:$0xff] %vm3191_vm7, %v2926_v19  ;;  %3315 = vst.msk [vmem:[%s6362_s22 + $0x3d8] sm:$0xff] %vm3191_vm7, %v3186_v22  ;;  %v2886_v27 = vadd.f32 %v4624_v25, %v6354_v50  ;;  %v3146_v29 = vadd.f32 %v4676_v26, %v6354_v50  ;;  %v2880_v30 = vpop.f32.mrb[89].mxu0  ;;  %v3140_v32 = vpop.f32.mrb[89].mxu1 }
 0x52b   : > { %3282 = vst.msk [vmem:[%s6362_s22 + $0x2d0] sm:$0xff] %vm3191_vm7, %v2925_v23  ;;  %3314 = vst.msk [vmem:[%s6362_s22 + $0x3d0] sm:$0xff] %vm3191_vm7, %v3185_v24  ;;  %v2881_v33 = vadd.f32 %v6354_v50, %v2880_v30  ;;  %v3141_v34 = vadd.f32 %v6354_v50, %v3140_v32 }
 0x52c   : > { %v2928_v35 = vmax.f32 %v2886_v27, 0.0  ;;  %v3188_v36 = vmax.f32 %v3146_v29, 0.0 }
 0x52d   : > { %v2927_v38 = vmax.f32 %v2881_v33, 0.0  ;;  %v3187_v39 = vmax.f32 %v3141_v34, 0.0  ;;  %v4627_v40 = vpop.f32.mrb[90].mxu0  ;;  %v4679_v42 = vpop.f32.mrb[90].mxu1 }
 0x52e   : > { %3285 = vst.msk [vmem:[%s6362_s22 + $0x2e8] sm:$0xff] %vm3191_vm7, %v2928_v35  ;;  %3317 = vst.msk [vmem:[%s6362_s22 + $0x3e8] sm:$0xff] %vm3191_vm7, %v3188_v36  ;;  %v2896_v43 = vadd.f32 %v4627_v40, %v6354_v50  ;;  %v3156_v6 = vadd.f32 %v4679_v42, %v6354_v50  ;;  %v2890_v45 = vpop.f32.mrb[91].mxu0  ;;  %v3150_v46 = vpop.f32.mrb[91].mxu1 }
 0x52f   : > { %3284 = vst.msk [vmem:[%s6362_s22 + $0x2e0] sm:$0xff] %vm3191_vm7, %v2927_v38  ;;  %3316 = vst.msk [vmem:[%s6362_s22 + $0x3e0] sm:$0xff] %vm3191_vm7, %v3187_v39  ;;  %v2891_v15 = vadd.f32 %v6354_v50, %v2890_v45  ;;  %v3151_v20 = vadd.f32 %v6354_v50, %v3150_v46 }
 0x530   : > { %v2930_v21 = vmax.f32 %v2896_v43, 0.0  ;;  %v3190_v28 = vmax.f32 %v3156_v6, 0.0 }
 0x531   : > { %v2929_v31 = vmax.f32 %v2891_v15, 0.0  ;;  %v3189_v37 = vmax.f32 %v3151_v20, 0.0 }
 0x532   : > { %3287 = vst.msk [vmem:[%s6362_s22 + $0x2f8] sm:$0xff] %vm3191_vm7, %v2930_v21  ;;  %3319 = vst.msk [vmem:[%s6362_s22 + $0x3f8] sm:$0xff] %vm3191_vm7, %v3190_v28 }
 0x533   : > { %3286 = vst.msk [vmem:[%s6362_s22 + $0x2f0] sm:$0xff] %vm3191_vm7, %v2929_v31  ;;  %3318 = vst.msk [vmem:[%s6362_s22 + $0x3f0] sm:$0xff] %vm3191_vm7, %v3189_v37 }
 0x534 PF: > { %s21_s17 = sadd.s32 1, %s5033_s17  }
 0x535   : > { %p18_p4 = scmp.ge.s32.totalorder %s21_s17, 4  }
 0x537   :  { %20 = sbr.rel (!%p18_p4) target bundleno = 1 (0x1), region = 109 }

</bundles_post_ra>
